<compile_context>
chip_gen: v6e
topology: v6e:2x2x1
jax: 0.10.0
libtpu: 0.0.40
codegen_flags: <defaults>
</compile_context>

<pallas_src>
import jax
import jax.numpy as jnp
from jax.experimental import pallas as pl
from jax.experimental.pallas import tpu as pltpu


def _round_up(x, m):
    return ((x + m - 1) // m) * m


def amil_kernel(x_ref, wab_ref, bab_ref, wc_ref, bc_ref, out_ref):
    tm = x_ref.shape[0]
    D = wc_ref.shape[1]

    # One fused MXU matmul produces both gate pre-activations: (tm, 2D) f32.
    ab = jnp.dot(x_ref[...], wab_ref[...], preferred_element_type=jnp.float32)
    ab = ab + bab_ref[...]

    a = jnp.tanh(ab[:, :D])            # (tm, D)  EUP
    b = jax.nn.sigmoid(ab[:, D:])      # (tm, D)  EUP
    gated = a * b                      # (tm, D)  VPU

    # Linear(D, 1) as multiply + lane reduce, emitted directly as a lane-dense
    # (tm//128, 128) slab (token index = row*128 + lane) -> unmasked vst.
    g3 = gated.reshape(tm // 128, 128, D)
    wc3 = wc_ref[...].reshape(1, 1, D)
    att = jnp.sum(g3 * wc3, axis=-1) + bc_ref[...]        # (tm//128, 128) f32
    out_ref[...] = att.astype(out_ref.dtype)


def amil_forward(x, params, *, tm_max=1024, use_bf16=True):
    """x: (B, N, L) or (N, L). Returns attention scores (B, N) in f32."""
    if x.ndim == 2:
        x = x[None, ...]
    B, N, L = x.shape
    wa, ba, wb, bb, wc, bc = params
    D = wa.shape[0]

    # Fused, transposed weights for row-major matmuls in the kernel.
    wab = jnp.concatenate([wa.T, wb.T], axis=1)              # (L, 2D)
    bab = jnp.concatenate([ba, bb]).reshape(1, 2 * D).astype(jnp.float32)
    wc_row = wc.reshape(1, D).astype(jnp.float32)            # (1, D)
    bc2 = bc.reshape(1, 1).astype(jnp.float32)               # (1, 1)

    M = B * N
    # Token tile: multiple of 128 (needed for the lane-dense output slab).
    # Small M collapses to a single grid step; large M tiles at tm_max.
    # Keep tm_max moderate so the grid has >= a few steps on multi-core parts.
    assert tm_max % 128 == 0 and tm_max >= 128
    tm = max(128, min(tm_max, _round_up(M, 128)))
    M_pad = _round_up(M, tm)
    G = M_pad // tm

    x2 = x.reshape(M, L)
    if M_pad != M:
        # Zero-pad extra token rows; their (garbage) scores are sliced off below.
        x2 = jnp.pad(x2, ((0, M_pad - M), (0, 0)))

    if use_bf16:
        # Halves HBM traffic for x (the mem-bound term); MXU accumulates in f32.
        x2 = x2.astype(jnp.bfloat16)
        wab = wab.astype(jnp.bfloat16)

    out = pl.pallas_call(
        amil_kernel,
        out_shape=jax.ShapeDtypeStruct((G, tm // 128, 128), jnp.float32),
        grid_spec=pltpu.PrefetchScalarGridSpec(
            num_scalar_prefetch=0,
            grid=(G,),
            in_specs=[
                pl.BlockSpec((tm, L), lambda i: (i, 0)),      # x tile
                pl.BlockSpec((L, 2 * D), lambda i: (0, 0)),   # [Wa^T | Wb^T] resident
                pl.BlockSpec((1, 2 * D), lambda i: (0, 0)),   # [ba | bb]
                pl.BlockSpec((1, D), lambda i: (0, 0)),       # wc row
                pl.BlockSpec((1, 1), lambda i: (0, 0)),       # bc
            ],
            # Lane-dense output: one (tm//128, 128) slab per grid step.
            out_specs=pl.BlockSpec((None, tm // 128, 128), lambda i: (i, 0, 0)),
        ),
        compiler_params=pltpu.CompilerParams(
            dimension_semantics=("parallel",),
        ),
    )(x2, wab, bab, wc_row, bc2)

    return out.reshape(M_pad)[:M].reshape(B, N)


def init_params(key, L, D):
    """Deterministic init matching nn.Linear parameter shapes."""
    k1, k2, k3, k4, k5, k6 = jax.random.split(key, 6)
    s_a = 1.0 / jnp.sqrt(L)
    s_c = 1.0 / jnp.sqrt(D)
    wa = jax.random.uniform(k1, (D, L), jnp.float32, -s_a, s_a)   # attention_a Linear(L, D)
    ba = jax.random.uniform(k2, (D,), jnp.float32, -s_a, s_a)
    wb = jax.random.uniform(k3, (D, L), jnp.float32, -s_a, s_a)   # attention_b Linear(L, D)
    bb = jax.random.uniform(k4, (D,), jnp.float32, -s_a, s_a)
    wc = jax.random.uniform(k5, (1, D), jnp.float32, -s_c, s_c)   # attention_c Linear(D, 1)
    bc = jax.random.uniform(k6, (1,), jnp.float32, -s_c, s_c)
    return (wa, ba, wb, bb, wc, bc)


def amil_reference(x, params):
    """Pure-JAX reference mirroring the PyTorch forward exactly."""
    if x.ndim == 2:
        x = x[None, ...]
    wa, ba, wb, bb, wc, bc = params
    a = jnp.tanh(x @ wa.T + ba)
    b = jax.nn.sigmoid(x @ wb.T + bb)
    att = (a * b) @ wc.T + bc
    return jnp.squeeze(att, axis=2)


# TODO(synk): the dropout=True branch of the module (nn.Dropout(0.25) on a/b)
# is not implemented; module default is dropout=False (eval semantics).

if __name__ == "__main__":
    # Small shapes consistent with the module (real defaults are L=1024, D=256).
    B, N, L, D = 2, 300, 128, 128
    key = jax.random.PRNGKey(0)
    kx, kp = jax.random.split(key)
    x = jax.random.normal(kx, (B, N, L), jnp.float32)
    params = init_params(kp, L, D)

    ref = amil_reference(x, params)

    # Full-precision path: M=600 -> single 640-row tile (grid of 1), 40 pad rows.
    out_f32 = jax.block_until_ready(amil_forward(x, params, tm_max=1024, use_bf16=False))
    assert out_f32.shape == (B, N)
    assert jnp.allclose(out_f32, ref, atol=1e-2, rtol=1e-2), "f32 mismatch vs reference"

    # bf16 x/weights (f32 accumulation), multi-step grid (tm=256 -> 3 steps) + padding.
    out_bf16 = jax.block_until_ready(amil_forward(x, params, tm_max=256, use_bf16=True))
    assert out_bf16.shape == (B, N)
    assert jnp.allclose(out_bf16, ref, atol=5e-2, rtol=5e-2), "bf16 mismatch vs reference"

    print("KERNEL_OK")
</pallas_src>

<mosaic_0001>
module attributes {stable_mosaic.version = 11 : i64} {
  func.func @amil_kernel(%arg0: i32, %arg1: memref<640x128xf32, #tpu.memory_space<vmem>>, %arg2: memref<128x256xf32, #tpu.memory_space<vmem>>, %arg3: memref<1x256xf32, #tpu.memory_space<vmem>>, %arg4: memref<1x128xf32, #tpu.memory_space<vmem>>, %arg5: memref<1x1xf32, #tpu.memory_space<vmem>>, %arg6: memref<1x5x128xf32, #tpu.memory_space<vmem>>) attributes {dimension_semantics = [#tpu.dimension_semantics<parallel>], iteration_bounds = array<i64: 1>, scalar_prefetch = 0 : i64, scratch_operands = 0 : i64, tpu.core_type = #tpu.core_type<tc>, window_params = [{transform_indices = @transform_0, window_bounds = array<i64: 640, 128>}, {pipeline_mode = #tpu.pipeline_mode<synchronous>, transform_indices = @transform_1, window_bounds = array<i64: 128, 256>}, {pipeline_mode = #tpu.pipeline_mode<synchronous>, transform_indices = @transform_2, window_bounds = array<i64: 1, 256>}, {pipeline_mode = #tpu.pipeline_mode<synchronous>, transform_indices = @transform_3, window_bounds = array<i64: 1, 128>}, {pipeline_mode = #tpu.pipeline_mode<synchronous>, transform_indices = @transform_4, window_bounds = array<i64: 1, 1>}, {transform_indices = @transform_5, window_bounds = array<i64: 1, 5, 128>}]} {
    %c0 = arith.constant 0 : index
    %c0_0 = arith.constant 0 : index
    %0 = vector.load %arg1[%c0, %c0_0] : memref<640x128xf32, #tpu.memory_space<vmem>>, vector<640x128xf32>
    %c0_1 = arith.constant 0 : index
    %c0_2 = arith.constant 0 : index
    %1 = vector.load %arg2[%c0_1, %c0_2] : memref<128x256xf32, #tpu.memory_space<vmem>>, vector<128x256xf32>
    %cst = arith.constant dense<0.000000e+00> : vector<640x256xf32>
    %2 = tpu.matmul %0, %1, %cst {dimension_numbers = #tpu.dot_dimension_numbers<[1], [0], [0], [1], [0, 0, 1, 1], [], []>} : vector<640x128xf32>, vector<128x256xf32>, vector<640x256xf32> -> vector<640x256xf32>
    %c0_3 = arith.constant 0 : index
    %c0_4 = arith.constant 0 : index
    %3 = vector.load %arg3[%c0_3, %c0_4] : memref<1x256xf32, #tpu.memory_space<vmem>>, vector<1x256xf32>
    %4 = vector.broadcast %3 : vector<1x256xf32> to vector<640x256xf32>
    %5 = arith.addf %2, %4 : vector<640x256xf32>
    %6 = vector.extract_strided_slice %5 {offsets = [0, 0], sizes = [640, 128], strides = [1, 1]} : vector<640x256xf32> to vector<640x128xf32>
    %7 = math.tanh %6 : vector<640x128xf32>
    %8 = vector.extract_strided_slice %5 {offsets = [0, 128], sizes = [640, 128], strides = [1, 1]} : vector<640x256xf32> to vector<640x128xf32>
    %9 = arith.negf %8 : vector<640x128xf32>
    %10 = math.exp %9 : vector<640x128xf32>
    %cst_5 = arith.constant 1.000000e+00 : f32
    %11 = vector.broadcast %cst_5 : f32 to vector<640x128xf32>
    %12 = arith.addf %11, %10 : vector<640x128xf32>
    %13 = arith.divf %11, %12 : vector<640x128xf32>
    %14 = arith.mulf %7, %13 : vector<640x128xf32>
    %15 = vector.shape_cast %14 : vector<640x128xf32> to vector<5x128x128xf32>
    %c0_6 = arith.constant 0 : index
    %c0_7 = arith.constant 0 : index
    %16 = vector.load %arg4[%c0_6, %c0_7] : memref<1x128xf32, #tpu.memory_space<vmem>>, vector<1x128xf32>
    %17 = vector.shape_cast %16 : vector<1x128xf32> to vector<1x1x128xf32>
    %18 = vector.broadcast %17 : vector<1x1x128xf32> to vector<5x128x128xf32>
    %19 = arith.mulf %15, %18 : vector<5x128x128xf32>
    %cst_8 = arith.constant dense<0.000000e+00> : vector<5x128xf32>
    %20 = vector.multi_reduction <add>, %19, %cst_8 [2] : vector<5x128x128xf32> to vector<5x128xf32>
    %c0_9 = arith.constant 0 : index
    %c0_10 = arith.constant 0 : index
    %21 = vector.load %arg5[%c0_9, %c0_10] : memref<1x1xf32, #tpu.memory_space<vmem>>, vector<1x1xf32>
    %22 = vector.broadcast %21 : vector<1x1xf32> to vector<5x128xf32>
    %23 = arith.addf %20, %22 : vector<5x128xf32>
    %c0_11 = arith.constant 0 : index
    %c0_12 = arith.constant 0 : index
    %c0_13 = arith.constant 0 : index
    %24 = vector.load %arg6[%c0_11, %c0_12, %c0_13] : memref<1x5x128xf32, #tpu.memory_space<vmem>>, vector<1x5x128xf32>
    %25 = vector.shape_cast %24 : vector<1x5x128xf32> to vector<5x128xf32>
    %26 = vector.shape_cast %23 : vector<5x128xf32> to vector<1x5x128xf32>
    tpu.vector_store %arg6[%c0_11, %c0_12, %c0_13], %26 {strides = array<i32>} : memref<1x5x128xf32, #tpu.memory_space<vmem>>, vector<1x5x128xf32>,
    return
  }
  func.func @transform_0(%arg0: i32) -> (i32, i32) {
    %c0_i32 = arith.constant 0 : i32
    %c0_i32_0 = arith.constant 0 : i32
    return %arg0, %c0_i32 : i32, i32
  }
  func.func @transform_1(%arg0: i32) -> (i32, i32) {
    %c0_i32 = arith.constant 0 : i32
    %c0_i32_0 = arith.constant 0 : i32
    %c0_i32_1 = arith.constant 0 : i32
    return %c0_i32, %c0_i32_0 : i32, i32
  }
  func.func @transform_2(%arg0: i32) -> (i32, i32) {
    %c0_i32 = arith.constant 0 : i32
    %c0_i32_0 = arith.constant 0 : i32
    %c0_i32_1 = arith.constant 0 : i32
    return %c0_i32, %c0_i32_0 : i32, i32
  }
  func.func @transform_3(%arg0: i32) -> (i32, i32) {
    %c0_i32 = arith.constant 0 : i32
    %c0_i32_0 = arith.constant 0 : i32
    %c0_i32_1 = arith.constant 0 : i32
    return %c0_i32, %c0_i32_0 : i32, i32
  }
  func.func @transform_4(%arg0: i32) -> (i32, i32) {
    %c0_i32 = arith.constant 0 : i32
    %c0_i32_0 = arith.constant 0 : i32
    %c0_i32_1 = arith.constant 0 : i32
    return %c0_i32, %c0_i32_0 : i32, i32
  }
  func.func @transform_5(%arg0: i32) -> (i32, i32, i32) {
    %c0_i32 = arith.constant 0 : i32
    %c0_i32_0 = arith.constant 0 : i32
    %c0_i32_1 = arith.constant 0 : i32
    return %arg0, %c0_i32, %c0_i32_0 : i32, i32, i32
  }
}

</mosaic_0001>

<bundles_post_ra>
// kernel: tpu_custom_call.1
= control target key start
LH: loop header
LB: loop body
LE: loop exit
PB: predicated region body
PF: predicated region fallthrough
CT: control target
= control target key end

     0   :  { %s4194_s0 = inlined_call_operand.hbm [shape: f32[640,128], index: 0, kind: input, shape index: {}]   ;;  %s4195_s1 = inlined_call_operand.hbm [shape: f32[128,256], index: 1, kind: input, shape index: {}]   ;;  %s4196_s2 = inlined_call_operand.vmem [shape: f32[1,256], index: 2, kind: input, shape index: {}]   ;;  %s4197_s3 = inlined_call_operand.vmem [shape: f32[1,128], index: 3, kind: input, shape index: {}]   ;;  %s4198_s4 = inlined_call_operand.<no memory space> [shape: f32[1,1], index: 4, kind: input, shape index: {}]   ;;  %s4199_s5 = inlined_call_operand.vmem [shape: f32[1,5,128], index: 5, kind: output, shape index: {}]  }
   0x1   :  { %v10_v0 = vstv %s4198_s4 }
   0x2   :  { %11 = vst [vmem:[#allocation2] sm:$0x1] %v10_v0 }
   0x3   :  { %12 = vsyncpa [#allocation4], 0 }
   0x4   :  { %13 = vsyncpa [#allocation6], 0  ;;  %s2869_s20 = smov [#allocation3]  }
   0x5   :  { %s19_s21 = sshll.u32 %s2869_s20, 4  ;;  %s20_s21 = int_to_ptr.vmem [resolvable:$true] %s19_s21 }
   0x6   :  { %s2833_s22 = scalar_lea.vmem %s20_s21, 10240  ;;  %p2838_p1 = scmp.lt.s32.totalorder %s20_s21, %s20_s21 }
   0x7   :  { %p2834_p0 = scmp.ne.s32.totalorder %s20_s21, %s2833_s22  ;;  %p2839_p2 = scmp.lt.s32.totalorder %s2833_s22, %s2833_s22 }
   0x9   :  { %p2840_p3 = por %p2839_p2, %p2838_p1 }
   0xb   :  { %p2841_p4 = pnand %p2840_p3, %p2834_p0 }
   0xd   :  { %2844 = shalt.err (!%p2841_p4)
}
   0xe   :  { %s2870_s23 = smov 128   ;;  %s2871_s24 = smov 8  }
   0xf   :  { %25 = dma.hbm_to_vmem [thread:$0]  %s4194_s0, 10240, %s20_s21, [#allocation4], %s2870_s23, %s2870_s23, %s2871_s24  }
  0x10   :  { %s2872_s4 = smov [#allocation5]  }
  0x11   :  { %s31_s27 = sshll.u32 %s2872_s4, 4  ;;  %s32_s27 = int_to_ptr.vmem [resolvable:$true] %s31_s27 }
  0x12   :  { %s2853_s28 = scalar_lea.vmem %s32_s27, 4096  ;;  %p2858_p6 = scmp.lt.s32.totalorder %s32_s27, %s32_s27 }
  0x13   :  { %p2854_p5 = scmp.ne.s32.totalorder %s32_s27, %s2853_s28  ;;  %p2859_p7 = scmp.lt.s32.totalorder %s2853_s28, %s2853_s28 }
  0x15   :  { %p2860_p8 = por %p2859_p7, %p2858_p6 }
  0x17   :  { %p2861_p9 = pnand %p2860_p8, %p2854_p5 }
  0x19   :  { %2864 = shalt.err (!%p2861_p9)
}
  0x1a   :  { %s2873_s29 = smov 256   ;;  %s2874_s30 = smov 16  }
  0x1b   :  { %37 = dma.hbm_to_vmem [thread:$0]  %s4195_s1, 4096, %s32_s27, [#allocation6], %s2873_s29, %s2873_s29, %s2874_s30  }
  0x1c   :  { %2865 = dma.done.wait [#allocation4], 10240  }
  0x1d   :  { %2866 = vsyncadd [#allocation4], 4294957056 }
  0x1e   :  { %2867 = dma.done.wait [#allocation6], 4096  }
  0x1f   :  { %2868 = vsyncadd [#allocation6], 4294963200  ;;  %v2875_v1 = vmov 0.0   ;;  %v161_v2 = vld [vmem:[#allocation5 + $0xf8] sm:$0xff]  ;;  %v160_v3 = vld [vmem:[#allocation5 + $0xf0] sm:$0xff]  ;;  %vm1787_vm0 = vcmask 130112  }
  0x20   :  { %238 = vmatprep.mubr.f32.mxu0 %v2875_v1  ;;  %478 = vmatprep.mubr.f32.mxu1 %v2875_v1  ;;  %v159_v4 = vld [vmem:[#allocation5 + $0xe8] sm:$0xff]  ;;  %v158_v5 = vld [vmem:[#allocation5 + $0xe0] sm:$0xff]  ;;  %v157_v6 = vld [vmem:[#allocation5 + $0xd8] sm:$0xff]  ;;  %vm1794_vm1 = vcmask 195712   ;;  %vm1801_vm2 = vcmask 261312   ;;  %vm1808_vm3 = vcmask 326912  }
  0x21   :  { %174 = vmatprep.subr.mxu0 %v161_v2  ;;  %2301 = vmatprep.subr.mxu1 %v161_v2  ;;  %v156_v7 = vld [vmem:[#allocation5 + $0xd0] sm:$0xff]  ;;  %v155_v8 = vld [vmem:[#allocation5 + $0xc8] sm:$0xff]  ;;  %v154_v9 = vld [vmem:[#allocation5 + $0xc0] sm:$0xff]  ;;  %vm1815_vm4 = vcmask 392512   ;;  %vm1822_vm5 = vcmask 458112   ;;  %vm1829_vm6 = vcmask 523712  }
  0x22   :  { %175 = vmatpush1.msra.mxu0 %v160_v3  ;;  %2317 = vmatpush1.msra.mxu1 %v160_v3  ;;  %v153_v10 = vld [vmem:[#allocation5 + $0xb8] sm:$0xff]  ;;  %v152_v11 = vld [vmem:[#allocation5 + $0xb0] sm:$0xff]  ;;  %v151_v12 = vld [vmem:[#allocation5 + $0xa8] sm:$0xff]  ;;  %vm1836_vm7 = vcmask 589312   ;;  %vm1843_vm8 = vcmask 654912   ;;  %vm1850_vm9 = vcmask 720512  }
  0x23   :  { %176 = vmatprep.subr.mxu0 %v159_v4  ;;  %2302 = vmatprep.subr.mxu1 %v159_v4  ;;  %v150_v13 = vld [vmem:[#allocation5 + $0xa0] sm:$0xff]  ;;  %v149_v14 = vld [vmem:[#allocation5 + $0x98] sm:$0xff]  ;;  %v148_v15 = vld [vmem:[#allocation5 + $0x90] sm:$0xff]  ;;  %vm1857_vm10 = vcmask 786112   ;;  %vm1864_vm11 = vcmask 851712   ;;  %vm1871_vm12 = vcmask 917312  }
  0x24   :  { %177 = vmatpush1.msra.mxu0 %v158_v5  ;;  %2318 = vmatpush1.msra.mxu1 %v158_v5  ;;  %v147_v16 = vld [vmem:[#allocation5 + $0x88] sm:$0xff]  ;;  %v146_v17 = vld [vmem:[#allocation5 + $0x80] sm:$0xff]  ;;  %v145_v18 = vld [vmem:[#allocation5 + $0x78] sm:$0xff]  ;;  %vm1878_vm13 = vcmask 982912   ;;  %vm1885_vm14 = vcmask 1048512   ;;  %vm2203_vm15 = vcmask 1041409  }
  0x25   :  { %178 = vmatprep.subr.mxu0 %v157_v6  ;;  %2303 = vmatprep.subr.mxu1 %v157_v6  ;;  %v144_v19 = vld [vmem:[#allocation5 + $0x70] sm:$0xff]  ;;  %v143_v20 = vld [vmem:[#allocation5 + $0x68] sm:$0xff]  ;;  %v142_v21 = vld [vmem:[#allocation5 + $0x60] sm:$0xff] }
  0x26   :  { %179 = vmatpush1.msra.mxu0 %v156_v7  ;;  %2319 = vmatpush1.msra.mxu1 %v156_v7  ;;  %v141_v22 = vld [vmem:[#allocation5 + $0x58] sm:$0xff]  ;;  %v140_v23 = vld [vmem:[#allocation5 + $0x50] sm:$0xff]  ;;  %v139_v24 = vld [vmem:[#allocation5 + $0x48] sm:$0xff] }
  0x27   :  { %180 = vmatprep.subr.mxu0 %v155_v8  ;;  %2304 = vmatprep.subr.mxu1 %v155_v8  ;;  %v138_v25 = vld [vmem:[#allocation5 + $0x40] sm:$0xff]  ;;  %v137_v26 = vld [vmem:[#allocation5 + $0x38] sm:$0xff]  ;;  %v136_v27 = vld [vmem:[#allocation5 + $0x30] sm:$0xff] }
  0x28   :  { %181 = vmatpush1.msra.mxu0 %v154_v9  ;;  %2320 = vmatpush1.msra.mxu1 %v154_v9  ;;  %v135_v28 = vld [vmem:[#allocation5 + $0x28] sm:$0xff]  ;;  %v134_v29 = vld [vmem:[#allocation5 + $0x20] sm:$0xff]  ;;  %v133_v30 = vld [vmem:[#allocation5 + $0x18] sm:$0xff] }
  0x29   :  { %182 = vmatprep.subr.mxu0 %v153_v10  ;;  %2305 = vmatprep.subr.mxu1 %v153_v10  ;;  %v132_v31 = vld [vmem:[#allocation5 + $0x10] sm:$0xff]  ;;  %v131_v32 = vld [vmem:[#allocation5 + $0x8] sm:$0xff]  ;;  %v130_v33 = vld [vmem:[#allocation5] sm:$0xff] }
  0x2a   :  { %183 = vmatpush1.msra.mxu0 %v152_v11  ;;  %2321 = vmatpush1.msra.mxu1 %v152_v11  ;;  %v50_v34 = vld [vmem:[#allocation3] sm:$0xff]  ;;  %v51_v36 = vld [vmem:[#allocation3 + $0x8] sm:$0xff]  ;;  %v52_v38 = vld [vmem:[#allocation3 + $0x10] sm:$0xff]  ;;  %v2876_v11 = vmov 0  }
  0x2b   :  { %184 = vmatprep.subr.mxu0 %v151_v12  ;;  %2306 = vmatprep.subr.mxu1 %v151_v12  ;;  %v90_v35 = vld [vmem:[#allocation3 + $0x140] sm:$0xff]  ;;  %v91_v37 = vld [vmem:[#allocation3 + $0x148] sm:$0xff]  ;;  %v92_v39 = vld [vmem:[#allocation3 + $0x150] sm:$0xff] }
  0x2c   :  { %185 = vmatpush1.msra.mxu0 %v150_v13  ;;  %2322 = vmatpush1.msra.mxu1 %v150_v13  ;;  %v53_v40 = vld [vmem:[#allocation3 + $0x18] sm:$0xff]  ;;  %v54_v42 = vld [vmem:[#allocation3 + $0x20] sm:$0xff]  ;;  %v55_v44 = vld [vmem:[#allocation3 + $0x28] sm:$0xff] }
  0x2d   :  { %186 = vmatprep.subr.mxu0 %v149_v14  ;;  %2307 = vmatprep.subr.mxu1 %v149_v14  ;;  %v93_v41 = vld [vmem:[#allocation3 + $0x158] sm:$0xff]  ;;  %v94_v43 = vld [vmem:[#allocation3 + $0x160] sm:$0xff]  ;;  %v95_v45 = vld [vmem:[#allocation3 + $0x168] sm:$0xff] }
  0x2e   :  { %187 = vmatpush1.msra.mxu0 %v148_v15  ;;  %2323 = vmatpush1.msra.mxu1 %v148_v15  ;;  %v56_v46 = vld [vmem:[#allocation3 + $0x30] sm:$0xff]  ;;  %v57_v48 = vld [vmem:[#allocation3 + $0x38] sm:$0xff]  ;;  %v58_v50 = vld [vmem:[#allocation3 + $0x40] sm:$0xff] }
  0x2f   :  { %188 = vmatprep.subr.mxu0 %v147_v16  ;;  %2308 = vmatprep.subr.mxu1 %v147_v16  ;;  %v96_v47 = vld [vmem:[#allocation3 + $0x170] sm:$0xff]  ;;  %v97_v49 = vld [vmem:[#allocation3 + $0x178] sm:$0xff]  ;;  %v98_v51 = vld [vmem:[#allocation3 + $0x180] sm:$0xff] }
  0x30   :  { %189 = vmatpush1.msra.mxu0 %v146_v17  ;;  %2324 = vmatpush1.msra.mxu1 %v146_v17  ;;  %v59_v52 = vld [vmem:[#allocation3 + $0x48] sm:$0xff]  ;;  %v60_v54 = vld [vmem:[#allocation3 + $0x50] sm:$0xff]  ;;  %v61_v56 = vld [vmem:[#allocation3 + $0x58] sm:$0xff] }
  0x31   :  { %190 = vmatprep.subr.mxu0 %v145_v18  ;;  %2309 = vmatprep.subr.mxu1 %v145_v18  ;;  %v99_v53 = vld [vmem:[#allocation3 + $0x188] sm:$0xff]  ;;  %v100_v55 = vld [vmem:[#allocation3 + $0x190] sm:$0xff]  ;;  %v101_v57 = vld [vmem:[#allocation3 + $0x198] sm:$0xff] }
  0x32   :  { %191 = vmatpush1.msra.mxu0 %v144_v19  ;;  %2325 = vmatpush1.msra.mxu1 %v144_v19  ;;  %v62_v58 = vld [vmem:[#allocation3 + $0x60] sm:$0xff]  ;;  %v63_v60 = vld [vmem:[#allocation3 + $0x68] sm:$0xff]  ;;  %v64_v62 = vld [vmem:[#allocation3 + $0x70] sm:$0xff] }
  0x33   :  { %192 = vmatprep.subr.mxu0 %v143_v20  ;;  %2310 = vmatprep.subr.mxu1 %v143_v20  ;;  %v102_v59 = vld [vmem:[#allocation3 + $0x1a0] sm:$0xff]  ;;  %v103_v61 = vld [vmem:[#allocation3 + $0x1a8] sm:$0xff]  ;;  %v104_v63 = vld [vmem:[#allocation3 + $0x1b0] sm:$0xff] }
  0x34   :  { %193 = vmatpush1.msra.mxu0 %v142_v21  ;;  %2326 = vmatpush1.msra.mxu1 %v142_v21  ;;  %v65_v0 = vld [vmem:[#allocation3 + $0x78] sm:$0xff]  ;;  %v66_v3 = vld [vmem:[#allocation3 + $0x80] sm:$0xff]  ;;  %v67_v5 = vld [vmem:[#allocation3 + $0x88] sm:$0xff] }
  0x35   :  { %194 = vmatprep.subr.mxu0 %v141_v22  ;;  %2311 = vmatprep.subr.mxu1 %v141_v22  ;;  %v105_v2 = vld [vmem:[#allocation3 + $0x1b8] sm:$0xff]  ;;  %v106_v4 = vld [vmem:[#allocation3 + $0x1c0] sm:$0xff]  ;;  %v107_v6 = vld [vmem:[#allocation3 + $0x1c8] sm:$0xff] }
  0x36   :  { %195 = vmatpush1.msra.mxu0 %v140_v23  ;;  %2327 = vmatpush1.msra.mxu1 %v140_v23  ;;  %v68_v7 = vld [vmem:[#allocation3 + $0x90] sm:$0xff]  ;;  %v69_v9 = vld [vmem:[#allocation3 + $0x98] sm:$0xff]  ;;  %v70_v13 = vld [vmem:[#allocation3 + $0xa0] sm:$0xff] }
  0x37   :  { %196 = vmatprep.subr.mxu0 %v139_v24  ;;  %2312 = vmatprep.subr.mxu1 %v139_v24  ;;  %v108_v8 = vld [vmem:[#allocation3 + $0x1d0] sm:$0xff]  ;;  %v109_v10 = vld [vmem:[#allocation3 + $0x1d8] sm:$0xff]  ;;  %v110_v14 = vld [vmem:[#allocation3 + $0x1e0] sm:$0xff] }
  0x38   :  { %197 = vmatpush1.msra.mxu0 %v138_v25  ;;  %2328 = vmatpush1.msra.mxu1 %v138_v25  ;;  %v2300_v12 = vld [vmem:[#allocation2] ss:$0 sm:$0xff]  ;;  %v71_v15 = vld [vmem:[#allocation3 + $0xa8] sm:$0xff]  ;;  %v72_v17 = vld [vmem:[#allocation3 + $0xb0] sm:$0xff] }
  0x39   :  { %198 = vmatprep.subr.mxu0 %v137_v26  ;;  %2313 = vmatprep.subr.mxu1 %v137_v26  ;;  %v111_v16 = vld [vmem:[#allocation3 + $0x1e8] sm:$0xff]  ;;  %v112_v18 = vld [vmem:[#allocation3 + $0x1f0] sm:$0xff]  ;;  %v73_v19 = vld [vmem:[#allocation3 + $0xb8] sm:$0xff] }
  0x3a   :  { %199 = vmatpush1.msra.mxu0 %v136_v27  ;;  %2329 = vmatpush1.msra.mxu1 %v136_v27  ;;  %v113_v20 = vld [vmem:[#allocation3 + $0x1f8] sm:$0xff]  ;;  %v74_v21 = vld [vmem:[#allocation3 + $0xc0] sm:$0xff]  ;;  %v75_v23 = vld [vmem:[#allocation3 + $0xc8] sm:$0xff] }
  0x3b   :  { %200 = vmatprep.subr.mxu0 %v135_v28  ;;  %2314 = vmatprep.subr.mxu1 %v135_v28  ;;  %v114_v22 = vld [vmem:[#allocation3 + $0x200] sm:$0xff]  ;;  %v115_v24 = vld [vmem:[#allocation3 + $0x208] sm:$0xff]  ;;  %v76_v25 = vld [vmem:[#allocation3 + $0xd0] sm:$0xff] }
  0x3c   :  { %201 = vmatpush1.msra.mxu0 %v134_v29  ;;  %2330 = vmatpush1.msra.mxu1 %v134_v29  ;;  %v116_v26 = vld [vmem:[#allocation3 + $0x210] sm:$0xff]  ;;  %v77_v27 = vld [vmem:[#allocation3 + $0xd8] sm:$0xff]  ;;  %v78_v29 = vld [vmem:[#allocation3 + $0xe0] sm:$0xff] }
  0x3d   :  { %202 = vmatprep.subr.mxu0 %v133_v30  ;;  %2315 = vmatprep.subr.mxu1 %v133_v30  ;;  %v117_v28 = vld [vmem:[#allocation3 + $0x218] sm:$0xff]  ;;  %v118_v30 = vld [vmem:[#allocation3 + $0x220] sm:$0xff] }
  0x3e   :  { %203 = vmatpush1.msra.mxu0 %v132_v31  ;;  %2331 = vmatpush1.msra.mxu1 %v132_v31  ;;  %v79_v31 = vld [vmem:[#allocation3 + $0xe8] sm:$0xff] }
  0x3f   :  { %204 = vmatprep.subr.mxu0 %v131_v32  ;;  %2316 = vmatprep.subr.mxu1 %v131_v32  ;;  %v119_v32 = vld [vmem:[#allocation3 + $0x228] sm:$0xff] }
  0x40   :  { %205 = vmatpush1.msra.mxu0 %v130_v33  ;;  %2332 = vmatpush1.msra.mxu1 %v130_v33  ;;  %v80_v33 = vld [vmem:[#allocation3 + $0xf0] sm:$0xff] }
  0x41   :  { %239 = vmatmul.mubr.f32.vlgmr.msra.gmra.mxu0 %v50_v34  ;;  %479 = vmatmul.mubr.f32.vlgmr.msra.gmra.mxu1 %v90_v35  ;;  %v120_v34 = vld [vmem:[#allocation3 + $0x230] sm:$0xff]  ;;  %v81_v35 = vld [vmem:[#allocation3 + $0xf8] sm:$0xff] }
  0x42   :  { %244 = vmatprep.mubr.f32.mxu0 %v2875_v1  ;;  %484 = vmatprep.mubr.f32.mxu1 %v2875_v1 }
  0x43   :  { %2341 = vset.pattern.permute.xlu1 %v2876_v11  ;;  %2342 = vset.pattern.permute.xlu0 %v2876_v11 }
  0x44   :  { %1613 = vperm.xlu1 %2341, %v2300_v12  }
  0x45   :  { %245 = vmatmul.mubr.f32.gmra.mxu0 %v51_v36  ;;  %485 = vmatmul.mubr.f32.gmra.mxu1 %v91_v37  ;;  %v121_v36 = vld [vmem:[#allocation3 + $0x238] sm:$0xff]  ;;  %v82_v37 = vld [vmem:[#allocation3 + $0x100] sm:$0xff] }
  0x46   :  { %250 = vmatprep.mubr.f32.mxu0 %v2875_v1  ;;  %490 = vmatprep.mubr.f32.mxu1 %v2875_v1 }
  0x49   :  { %251 = vmatmul.mubr.f32.gmra.mxu0 %v52_v38  ;;  %491 = vmatmul.mubr.f32.gmra.mxu1 %v92_v39  ;;  %v122_v38 = vld [vmem:[#allocation3 + $0x240] sm:$0xff]  ;;  %v83_v39 = vld [vmem:[#allocation3 + $0x108] sm:$0xff] }
  0x4a   :  { %256 = vmatprep.mubr.f32.mxu0 %v2875_v1  ;;  %496 = vmatprep.mubr.f32.mxu1 %v2875_v1 }
  0x4d   :  { %257 = vmatmul.mubr.f32.gmra.mxu0 %v53_v40  ;;  %497 = vmatmul.mubr.f32.gmra.mxu1 %v93_v41  ;;  %v123_v40 = vld [vmem:[#allocation3 + $0x248] sm:$0xff]  ;;  %v84_v41 = vld [vmem:[#allocation3 + $0x110] sm:$0xff] }
  0x4e   :  { %262 = vmatprep.mubr.f32.mxu0 %v2875_v1  ;;  %502 = vmatprep.mubr.f32.mxu1 %v2875_v1 }
  0x51   :  { %263 = vmatmul.mubr.f32.gmra.mxu0 %v54_v42  ;;  %503 = vmatmul.mubr.f32.gmra.mxu1 %v94_v43  ;;  %v124_v42 = vld [vmem:[#allocation3 + $0x250] sm:$0xff]  ;;  %v85_v43 = vld [vmem:[#allocation3 + $0x118] sm:$0xff] }
  0x52   :  { %268 = vmatprep.mubr.f32.mxu0 %v2875_v1  ;;  %508 = vmatprep.mubr.f32.mxu1 %v2875_v1 }
  0x55   :  { %269 = vmatmul.mubr.f32.gmra.mxu0 %v55_v44  ;;  %509 = vmatmul.mubr.f32.gmra.mxu1 %v95_v45  ;;  %v125_v44 = vld [vmem:[#allocation3 + $0x258] sm:$0xff]  ;;  %v86_v45 = vld [vmem:[#allocation3 + $0x120] sm:$0xff] }
  0x56   :  { %274 = vmatprep.mubr.f32.mxu0 %v2875_v1  ;;  %514 = vmatprep.mubr.f32.mxu1 %v2875_v1 }
  0x59   :  { %275 = vmatmul.mubr.f32.gmra.mxu0 %v56_v46  ;;  %515 = vmatmul.mubr.f32.gmra.mxu1 %v96_v47  ;;  %v126_v46 = vld [vmem:[#allocation3 + $0x260] sm:$0xff]  ;;  %v87_v47 = vld [vmem:[#allocation3 + $0x128] sm:$0xff] }
  0x5a   :  { %280 = vmatprep.mubr.f32.mxu0 %v2875_v1  ;;  %520 = vmatprep.mubr.f32.mxu1 %v2875_v1 }
  0x5d   :  { %281 = vmatmul.mubr.f32.gmra.mxu0 %v57_v48  ;;  %521 = vmatmul.mubr.f32.gmra.mxu1 %v97_v49  ;;  %v127_v48 = vld [vmem:[#allocation3 + $0x268] sm:$0xff]  ;;  %v88_v49 = vld [vmem:[#allocation3 + $0x130] sm:$0xff] }
  0x5e   :  { %286 = vmatprep.mubr.f32.mxu0 %v2875_v1  ;;  %526 = vmatprep.mubr.f32.mxu1 %v2875_v1 }
  0x61   :  { %287 = vmatmul.mubr.f32.gmra.mxu0 %v58_v50  ;;  %527 = vmatmul.mubr.f32.gmra.mxu1 %v98_v51  ;;  %v128_v50 = vld [vmem:[#allocation3 + $0x270] sm:$0xff]  ;;  %v89_v51 = vld [vmem:[#allocation3 + $0x138] sm:$0xff] }
  0x62   :  { %292 = vmatprep.mubr.f32.mxu0 %v2875_v1  ;;  %532 = vmatprep.mubr.f32.mxu1 %v2875_v1 }
  0x65   :  { %293 = vmatmul.mubr.f32.gmra.mxu0 %v59_v52  ;;  %533 = vmatmul.mubr.f32.gmra.mxu1 %v99_v53  ;;  %v129_v52 = vld [vmem:[#allocation3 + $0x278] sm:$0xff]  ;;  %v164_v53 = vlaneseq }
  0x66   :  { %298 = vmatprep.mubr.f32.mxu0 %v2875_v1  ;;  %538 = vmatprep.mubr.f32.mxu1 %v2875_v1 }
  0x69   :  { %299 = vmatmul.mubr.f32.gmra.mxu0 %v60_v54  ;;  %539 = vmatmul.mubr.f32.gmra.mxu1 %v100_v55  ;;  %v2997_v54 = vshrl.u32 %v164_v53, 7 }
  0x6a   :  { %304 = vmatprep.mubr.f32.mxu0 %v2875_v1  ;;  %544 = vmatprep.mubr.f32.mxu1 %v2875_v1 }
  0x6b   :  { %v166_v55 = vsub.s32 0, %v2997_v54 }
  0x6d   :  { %305 = vmatmul.mubr.f32.gmra.mxu0 %v61_v56  ;;  %545 = vmatmul.mubr.f32.gmra.mxu1 %v101_v57  ;;  %v162_v56 = vld [vmem:[%s4196_s2] sm:$0x3]  ;;  %v170_v57 = vsub.s32 1, %v2997_v54 }
  0x6e   :  { %310 = vmatprep.mubr.f32.mxu0 %v2875_v1  ;;  %550 = vmatprep.mubr.f32.mxu1 %v2875_v1 }
  0x71   :  { %311 = vmatmul.mubr.f32.gmra.mxu0 %v62_v58  ;;  %551 = vmatmul.mubr.f32.gmra.mxu1 %v102_v59  ;;  %v3004_v58 = vrot.slane %v162_v56, %v166_v55  ;;  %v3006_v59 = vrot.slane %v162_v56, %v170_v57 }
  0x72   :  { %316 = vmatprep.mubr.f32.mxu0 %v2875_v1  ;;  %556 = vmatprep.mubr.f32.mxu1 %v2875_v1 }
  0x75   :  { %317 = vmatmul.mubr.f32.gmra.mxu0 %v63_v60  ;;  %557 = vmatmul.mubr.f32.gmra.mxu1 %v103_v61 }
  0x76   :  { %322 = vmatprep.mubr.f32.mxu0 %v2875_v1  ;;  %562 = vmatprep.mubr.f32.mxu1 %v2875_v1 }
  0x79   :  { %323 = vmatmul.mubr.f32.gmra.mxu0 %v64_v62  ;;  %563 = vmatmul.mubr.f32.gmra.mxu1 %v104_v63 }
  0x7a   :  { %328 = vmatprep.mubr.f32.mxu0 %v2875_v1  ;;  %568 = vmatprep.mubr.f32.mxu1 %v2875_v1 }
  0x7d   :  { %329 = vmatmul.mubr.f32.gmra.mxu0 %v65_v0  ;;  %569 = vmatmul.mubr.f32.gmra.mxu1 %v105_v2 }
  0x7e   :  { %334 = vmatprep.mubr.f32.mxu0 %v2875_v1  ;;  %574 = vmatprep.mubr.f32.mxu1 %v2875_v1 }
  0x81   :  { %335 = vmatmul.mubr.f32.gmra.mxu0 %v66_v3  ;;  %575 = vmatmul.mubr.f32.gmra.mxu1 %v106_v4 }
  0x82   :  { %340 = vmatprep.mubr.f32.mxu0 %v2875_v1  ;;  %580 = vmatprep.mubr.f32.mxu1 %v2875_v1 }
  0x85   :  { %341 = vmatmul.mubr.f32.gmra.mxu0 %v67_v5  ;;  %581 = vmatmul.mubr.f32.gmra.mxu1 %v107_v6 }
  0x86   :  { %346 = vmatprep.mubr.f32.mxu0 %v2875_v1  ;;  %586 = vmatprep.mubr.f32.mxu1 %v2875_v1 }
  0x89   :  { %347 = vmatmul.mubr.f32.gmra.mxu0 %v68_v7  ;;  %587 = vmatmul.mubr.f32.gmra.mxu1 %v108_v8 }
  0x8a   :  { %352 = vmatprep.mubr.f32.mxu0 %v2875_v1  ;;  %592 = vmatprep.mubr.f32.mxu1 %v2875_v1 }
  0x8d   :  { %353 = vmatmul.mubr.f32.gmra.mxu0 %v69_v9  ;;  %593 = vmatmul.mubr.f32.gmra.mxu1 %v109_v10 }
  0x8e   :  { %358 = vmatprep.mubr.f32.mxu0 %v2875_v1  ;;  %598 = vmatprep.mubr.f32.mxu1 %v2875_v1 }
  0x91   :  { %359 = vmatmul.mubr.f32.gmra.mxu0 %v70_v13  ;;  %599 = vmatmul.mubr.f32.gmra.mxu1 %v110_v14 }
  0x92   :  { %364 = vmatprep.mubr.f32.mxu0 %v2875_v1  ;;  %604 = vmatprep.mubr.f32.mxu1 %v2875_v1 }
  0x95   :  { %365 = vmatmul.mubr.f32.gmra.mxu0 %v71_v15  ;;  %605 = vmatmul.mubr.f32.gmra.mxu1 %v111_v16 }
  0x96   :  { %370 = vmatprep.mubr.f32.mxu0 %v2875_v1  ;;  %610 = vmatprep.mubr.f32.mxu1 %v2875_v1 }
  0x99   :  { %371 = vmatmul.mubr.f32.gmra.mxu0 %v72_v17  ;;  %611 = vmatmul.mubr.f32.gmra.mxu1 %v112_v18 }
  0x9a   :  { %376 = vmatprep.mubr.f32.mxu0 %v2875_v1  ;;  %616 = vmatprep.mubr.f32.mxu1 %v2875_v1 }
  0x9d   :  { %377 = vmatmul.mubr.f32.gmra.mxu0 %v73_v19  ;;  %617 = vmatmul.mubr.f32.gmra.mxu1 %v113_v20 }
  0x9e   :  { %382 = vmatprep.mubr.f32.mxu0 %v2875_v1  ;;  %622 = vmatprep.mubr.f32.mxu1 %v2875_v1 }
  0xa1   :  { %383 = vmatmul.mubr.f32.gmra.mxu0 %v74_v21  ;;  %623 = vmatmul.mubr.f32.gmra.mxu1 %v114_v22 }
  0xa2   :  { %388 = vmatprep.mubr.f32.mxu0 %v2875_v1  ;;  %628 = vmatprep.mubr.f32.mxu1 %v2875_v1 }
  0xa5   :  { %389 = vmatmul.mubr.f32.gmra.mxu0 %v75_v23  ;;  %629 = vmatmul.mubr.f32.gmra.mxu1 %v115_v24 }
  0xa6   :  { %394 = vmatprep.mubr.f32.mxu0 %v2875_v1  ;;  %634 = vmatprep.mubr.f32.mxu1 %v2875_v1 }
  0xa9   :  { %395 = vmatmul.mubr.f32.gmra.mxu0 %v76_v25  ;;  %635 = vmatmul.mubr.f32.gmra.mxu1 %v116_v26 }
  0xaa   :  { %400 = vmatprep.mubr.f32.mxu0 %v2875_v1  ;;  %640 = vmatprep.mubr.f32.mxu1 %v2875_v1 }
  0xad   :  { %401 = vmatmul.mubr.f32.gmra.mxu0 %v77_v27  ;;  %641 = vmatmul.mubr.f32.gmra.mxu1 %v117_v28 }
  0xae   :  { %406 = vmatprep.mubr.f32.mxu0 %v2875_v1  ;;  %646 = vmatprep.mubr.f32.mxu1 %v2875_v1 }
  0xb1   :  { %407 = vmatmul.mubr.f32.gmra.mxu0 %v78_v29  ;;  %647 = vmatmul.mubr.f32.gmra.mxu1 %v118_v30 }
  0xb2   :  { %412 = vmatprep.mubr.f32.mxu0 %v2875_v1  ;;  %652 = vmatprep.mubr.f32.mxu1 %v2875_v1 }
  0xb5   :  { %413 = vmatmul.mubr.f32.gmra.mxu0 %v79_v31  ;;  %653 = vmatmul.mubr.f32.gmra.mxu1 %v119_v32 }
  0xb6   :  { %418 = vmatprep.mubr.f32.mxu0 %v2875_v1  ;;  %658 = vmatprep.mubr.f32.mxu1 %v2875_v1 }
  0xb9   :  { %419 = vmatmul.mubr.f32.gmra.mxu0 %v80_v33  ;;  %659 = vmatmul.mubr.f32.gmra.mxu1 %v120_v34 }
  0xba   :  { %424 = vmatprep.mubr.f32.mxu0 %v2875_v1  ;;  %664 = vmatprep.mubr.f32.mxu1 %v2875_v1 }
  0xbd   :  { %425 = vmatmul.mubr.f32.gmra.mxu0 %v81_v35  ;;  %665 = vmatmul.mubr.f32.gmra.mxu1 %v121_v36 }
  0xbe   :  { %430 = vmatprep.mubr.f32.mxu0 %v2875_v1  ;;  %670 = vmatprep.mubr.f32.mxu1 %v2875_v1 }
  0xc1   :  { %431 = vmatmul.mubr.f32.gmra.mxu0 %v82_v37  ;;  %671 = vmatmul.mubr.f32.gmra.mxu1 %v122_v38 }
  0xc2   :  { %436 = vmatprep.mubr.f32.mxu0 %v2875_v1  ;;  %676 = vmatprep.mubr.f32.mxu1 %v2875_v1 }
  0xc5   :  { %437 = vmatmul.mubr.f32.gmra.mxu0 %v83_v39  ;;  %677 = vmatmul.mubr.f32.gmra.mxu1 %v123_v40 }
  0xc6   :  { %442 = vmatprep.mubr.f32.mxu0 %v2875_v1  ;;  %682 = vmatprep.mubr.f32.mxu1 %v2875_v1 }
  0xc9   :  { %443 = vmatmul.mubr.f32.gmra.mxu0 %v84_v41  ;;  %683 = vmatmul.mubr.f32.gmra.mxu1 %v124_v42 }
  0xca   :  { %448 = vmatprep.mubr.f32.mxu0 %v2875_v1  ;;  %688 = vmatprep.mubr.f32.mxu1 %v2875_v1 }
  0xcd   :  { %449 = vmatmul.mubr.f32.gmra.mxu0 %v85_v43  ;;  %689 = vmatmul.mubr.f32.gmra.mxu1 %v125_v44 }
  0xce   :  { %454 = vmatprep.mubr.f32.mxu0 %v2875_v1  ;;  %694 = vmatprep.mubr.f32.mxu1 %v2875_v1 }
  0xd1   :  { %455 = vmatmul.mubr.f32.gmra.mxu0 %v86_v45  ;;  %695 = vmatmul.mubr.f32.gmra.mxu1 %v126_v46 }
  0xd2   :  { %460 = vmatprep.mubr.f32.mxu0 %v2875_v1  ;;  %700 = vmatprep.mubr.f32.mxu1 %v2875_v1 }
  0xd5   :  { %461 = vmatmul.mubr.f32.gmra.mxu0 %v87_v47  ;;  %701 = vmatmul.mubr.f32.gmra.mxu1 %v127_v48 }
  0xd6   :  { %466 = vmatprep.mubr.f32.mxu0 %v2875_v1  ;;  %706 = vmatprep.mubr.f32.mxu1 %v2875_v1 }
  0xd9   :  { %467 = vmatmul.mubr.f32.gmra.mxu0 %v88_v49  ;;  %707 = vmatmul.mubr.f32.gmra.mxu1 %v128_v50 }
  0xda   :  { %472 = vmatprep.mubr.f32.mxu0 %v2875_v1  ;;  %712 = vmatprep.mubr.f32.mxu1 %v2875_v1 }
  0xdd   :  { %473 = vmatmul.mubr.f32.gmra.mxu0 %v89_v51  ;;  %713 = vmatmul.mubr.f32.gmra.mxu1 %v129_v52 }
 0x101   :  { %v240_v1 = vpop.f32.mrf.mxu0  ;;  %v480_v60 = vpop.f32.mrf.mxu1 }
 0x102   :  { %v241_v61 = vadd.f32 %v240_v1, %v3004_v58  ;;  %v481_v5 = vadd.f32 %v480_v60, %v3004_v58 }
 0x103   :  { %v242_v62 = vpop.f32.mrf.mxu0  ;;  %v482_v63 = vpop.f32.mrf.mxu1 }
 0x104   :  { %v243_v0 = vadd.f32 %v242_v62, %v3006_v59  ;;  %v483_v2 = vadd.f32 %v482_v63, %v3006_v59  ;;  %2343 = vtanh.f32 %v241_v61 }
 0x105   :  { %v246_v3 = vpop.f32.mrf.mxu0  ;;  %v486_v4 = vpop.f32.mrf.mxu1 }
 0x106   :  { %v2219_v6 = vmul.f32 -1.442695, %v243_v0  ;;  %v2259_v7 = vmul.f32 -1.442695, %v483_v2  ;;  %v247_v8 = vadd.f32 %v246_v3, %v3004_v58  ;;  %v487_v15 = vadd.f32 %v486_v4, %v3004_v58 }
 0x107   :  { %v248_v9 = vpop.f32.mrf.mxu0  ;;  %v488_v10 = vpop.f32.mrf.mxu1 }
 0x108   :  { %2345 = vpow2.f32 %v2219_v6  ;;  %v249_v11 = vadd.f32 %v248_v9, %v3006_v59  ;;  %v489_v12 = vadd.f32 %v488_v10, %v3006_v59 }
 0x109   :  { %2347 = vpow2.f32 %v2259_v7  ;;  %v252_v13 = vpop.f32.mrf.mxu0  ;;  %v492_v14 = vpop.f32.mrf.mxu1 }
 0x10a   :  { %2349 = vtanh.f32 %v481_v5  ;;  %v2220_v16 = vmul.f32 -1.442695, %v249_v11  ;;  %v2260_v17 = vmul.f32 -1.442695, %v489_v12  ;;  %v253_v18 = vadd.f32 %v252_v13, %v3004_v58 }
 0x10b   :  { %2351 = vtanh.f32 %v247_v8  ;;  %v254_v19 = vpop.f32.mrf.mxu0  ;;  %v494_v20 = vpop.f32.mrf.mxu1  ;;  %v493_v25 = vadd.f32 %v492_v14, %v3004_v58 }
 0x10c   :  { %2353 = vpow2.f32 %v2220_v16  ;;  %v255_v21 = vadd.f32 %v254_v19, %v3006_v59  ;;  %v495_v22 = vadd.f32 %v494_v20, %v3006_v59 }
 0x10d   :  { %2355 = vpow2.f32 %v2260_v17  ;;  %v258_v23 = vpop.f32.mrf.mxu0  ;;  %v498_v24 = vpop.f32.mrf.mxu1 }
 0x10e   :  { %2357 = vtanh.f32 %v487_v15  ;;  %v2221_v26 = vmul.f32 -1.442695, %v255_v21  ;;  %v2261_v27 = vmul.f32 -1.442695, %v495_v22  ;;  %v259_v28 = vadd.f32 %v258_v23, %v3004_v58 }
 0x10f   :  { %2359 = vtanh.f32 %v253_v18  ;;  %v260_v29 = vpop.f32.mrf.mxu0  ;;  %v500_v30 = vpop.f32.mrf.mxu1  ;;  %v499_v35 = vadd.f32 %v498_v24, %v3004_v58 }
 0x110   :  { %2361 = vpow2.f32 %v2221_v26  ;;  %v261_v31 = vadd.f32 %v260_v29, %v3006_v59  ;;  %v501_v32 = vadd.f32 %v500_v30, %v3006_v59 }
 0x111   :  { %2363 = vpow2.f32 %v2261_v27  ;;  %v264_v33 = vpop.f32.mrf.mxu0  ;;  %v504_v34 = vpop.f32.mrf.mxu1 }
 0x112   :  { %2365 = vtanh.f32 %v493_v25  ;;  %v2222_v36 = vmul.f32 -1.442695, %v261_v31  ;;  %v2262_v37 = vmul.f32 -1.442695, %v501_v32  ;;  %v265_v38 = vadd.f32 %v264_v33, %v3004_v58  ;;  %v3025_v41 = vpop.eup %2343 }
 0x113   :  { %2367 = vtanh.f32 %v259_v28  ;;  %v266_v39 = vpop.f32.mrf.mxu0  ;;  %v506_v40 = vpop.f32.mrf.mxu1  ;;  %v505_v0 = vadd.f32 %v504_v34, %v3004_v58 }
 0x114   :  { %2369 = vpow2.f32 %v2222_v36  ;;  %v267_v42 = vadd.f32 %v266_v39, %v3006_v59  ;;  %v507_v43 = vadd.f32 %v506_v40, %v3006_v59 }
 0x115   :  { %v2346_v44 = vpop.eup %2345  ;;  %2371 = vpow2.f32 %v2262_v37  ;;  %v270_v45 = vpop.f32.mrf.mxu0 }
 0x116   :  { %v510_v46 = vpop.f32.mrf.mxu1  ;;  %v2348_v47 = vpop.eup %2347  ;;  %v1039_v48 = vadd.f32 1.0, %v2346_v44  ;;  %2373 = vtanh.f32 %v499_v35  ;;  %v2223_v49 = vmul.f32 -1.442695, %v267_v42  ;;  %v2263_v52 = vmul.f32 -1.442695, %v507_v43 }
 0x117   :  { %v3029_v50 = vpop.eup %2349  ;;  %v1079_v51 = vadd.f32 1.0, %v2348_v47  ;;  %2375 = vtanh.f32 %v265_v38  ;;  %v272_v55 = vpop.f32.mrf.mxu0  ;;  %v271_v5 = vadd.f32 %v270_v45, %v3004_v58  ;;  %v511_v29 = vadd.f32 %v510_v46, %v3004_v58  ;;  %v3069_v44 = vld [vmem:[%s4197_s3] ss:$0 sm:$0xff] }
 0x118   :  { %v512_v56 = vpop.f32.mrf.mxu1  ;;  %v3031_v57 = vpop.eup %2351  ;;  %2377 = vrcp.f32 %v1039_v48  ;;  %v273_v2 = vadd.f32 %v272_v55, %v3006_v59 }
 0x119   :  { %v2354_v1 = vpop.eup %2353  ;;  %2379 = vrcp.f32 %v1079_v51  ;;  %v276_v60 = vpop.f32.mrf.mxu0  ;;  %v513_v6 = vadd.f32 %v512_v56, %v3006_v59 }
 0x11a   :  { %v3033_v61 = vpop.f32.mrf.mxu1  ;;  %v2356_v62 = vpop.eup %2355  ;;  %v1040_v63 = vadd.f32 1.0, %v2354_v1  ;;  %2381 = vpow2.f32 %v2223_v49  ;;  %v2224_v15 = vmul.f32 -1.442695, %v273_v2  ;;  %v277_v32 = vadd.f32 %v276_v60, %v3004_v58 }
 0x11b   :  { %v3037_v3 = vpop.eup %2357  ;;  %v1080_v4 = vadd.f32 1.0, %v2356_v62  ;;  %2383 = vpow2.f32 %v2263_v52  ;;  %v278_v7 = vpop.f32.mrf.mxu0  ;;  %v2264_v18 = vmul.f32 -1.442695, %v513_v6  ;;  %v517_v55 = vadd.f32 %v3033_v61, %v3004_v58 }
 0x11c   :  { %v518_v8 = vpop.f32.mrf.mxu1  ;;  %v3041_v9 = vpop.eup %2359  ;;  %2385 = vrcp.f32 %v1040_v63  ;;  %v279_v22 = vadd.f32 %v278_v7, %v3006_v59 }
 0x11d   :  { %v2362_v10 = vpop.eup %2361  ;;  %2387 = vrcp.f32 %v1080_v4  ;;  %v282_v11 = vpop.f32.mrf.mxu0  ;;  %v519_v24 = vadd.f32 %v518_v8, %v3006_v59 }
 0x11e   :  { %v3043_v12 = vpop.f32.mrf.mxu1  ;;  %v2364_v13 = vpop.eup %2363  ;;  %v1041_v14 = vadd.f32 1.0, %v2362_v10  ;;  %2389 = vtanh.f32 %v505_v0  ;;  %v2225_v36 = vmul.f32 -1.442695, %v279_v22  ;;  %v283_v56 = vadd.f32 %v282_v11, %v3004_v58 }
 0x11f   :  { %v3045_v16 = vpop.eup %2365  ;;  %v1081_v17 = vadd.f32 1.0, %v2364_v13  ;;  %2391 = vtanh.f32 %v271_v5  ;;  %v284_v19 = vpop.f32.mrf.mxu0  ;;  %v2265_v38 = vmul.f32 -1.442695, %v519_v24 }
 0x120   :  { %v524_v20 = vpop.f32.mrf.mxu1  ;;  %v3047_v21 = vpop.eup %2367  ;;  %2393 = vrcp.f32 %v1041_v14  ;;  %v285_v43 = vadd.f32 %v284_v19, %v3006_v59 }
 0x121   :  { %v2370_v23 = vpop.eup %2369  ;;  %2395 = vrcp.f32 %v1081_v17  ;;  %v3051_v25 = vpop.f32.mrf.mxu0  ;;  %v525_v46 = vadd.f32 %v524_v20, %v3006_v59 }
 0x122   :  { %v3053_v26 = vpop.f32.mrf.mxu1  ;;  %v2372_v27 = vpop.eup %2371  ;;  %v1042_v28 = vadd.f32 1.0, %v2370_v23  ;;  %2397 = vpow2.f32 %v2224_v15  ;;  %v2226_v4 = vmul.f32 -1.442695, %v285_v43 }
 0x123   :  { %v3056_v30 = vpop.eup %2373  ;;  %v1082_v31 = vadd.f32 1.0, %v2372_v27  ;;  %2399 = vpow2.f32 %v2264_v18  ;;  %v290_v33 = vpop.f32.mrf.mxu0  ;;  %v2266_v61 = vmul.f32 -1.442695, %v525_v46  ;;  %v529_v46 = vadd.f32 %v3053_v26, %v3004_v58 }
 0x124   :  { %v530_v34 = vpop.f32.mrf.mxu1  ;;  %v3059_v35 = vpop.eup %2375  ;;  %2401 = vrcp.f32 %v1042_v28  ;;  %v291_v11 = vadd.f32 %v290_v33, %v3006_v59 }
 0x125   :  { %v2378_v37 = vpop.eup %2377  ;;  %2403 = vrcp.f32 %v1082_v31  ;;  %v3061_v39 = vpop.f32.mrf.mxu0  ;;  %v531_v13 = vadd.f32 %v530_v34, %v3006_v59 }
 0x126   :  { %v3063_v40 = vpop.f32.mrf.mxu1  ;;  %v2380_v42 = vpop.eup %2379  ;;  %2405 = vtanh.f32 %v511_v29  ;;  %v1279_v49 = vmul.f32 %v2378_v37, %v3025_v41  ;;  %v2227_v29 = vmul.f32 -1.442695, %v291_v11  ;;  %v295_v11 = vadd.f32 %v3061_v39, %v3004_v58 }
 0x127   :  { %v2382_v45 = vpop.eup %2381  ;;  %2407 = vtanh.f32 %v277_v32  ;;  %v296_v47 = vpop.f32.mrf.mxu0  ;;  %v1319_v2 = vmul.f32 %v2380_v42, %v3029_v50  ;;  %v523_v50 = vadd.f32 %v3043_v12, %v3004_v58  ;;  %v2267_v31 = vmul.f32 -1.442695, %v531_v13 }
 0x128   :  { %v3072_v48 = vpop.f32.mrf.mxu1  ;;  %v2384_v51 = vpop.eup %2383  ;;  %v1043_v52 = vadd.f32 1.0, %v2382_v45  ;;  %2409 = vpow2.f32 %v2225_v36  ;;  %v1366_v0 = vmul.f32 %v3069_v44, %v1279_v49  ;;  %v297_v43 = vadd.f32 %v296_v47, %v3006_v59 }
 0x129   :  { %v2386_v1 = vpop.eup %2385  ;;  %v1083_v60 = vadd.f32 1.0, %v2384_v51  ;;  %2411 = vpow2.f32 %v2265_v38  ;;  %v3078_v62 = vpop.f32.mrf.mxu0  ;;  %v537_v49 = vadd.f32 %v3072_v48, %v3006_v59 }
 0x12a   :  { %v3080_v63 = vpop.f32.mrf.mxu1  ;;  %v2388_v41 = vpop.eup %2387  ;;  %2413 = vrcp.f32 %v1043_v52  ;;  %1446 = vadd.xlane.f32.xlu0 %v1366_v0  ;;  %v1280_v19 = vmul.f32 %v2386_v1, %v3031_v57 }
 0x12b   :  { %v3084_v5 = vpop.eup %2389  ;;  %2415 = vrcp.f32 %v1083_v60  ;;  %v3086_v6 = vpop.f32.mrf.mxu0  ;;  %v1320_v8 = vmul.f32 %v2388_v41, %v3037_v3  ;;  %v1406_v3 = vmul.f32 %v3069_v44, %v1319_v2  ;;  %v2228_v2 = vmul.f32 -1.442695, %v297_v43 }
 0x12c   :  { %v3088_v7 = vpop.f32.mrf.mxu1  ;;  %v3091_v10 = vpop.eup %2391  ;;  %2417 = vtanh.f32 %v517_v55  ;;  %v1367_v37 = vmul.f32 %v3069_v44, %v1280_v19 }
 0x12d   :  { %v2394_v14 = vpop.eup %2393  ;;  %2419 = vtanh.f32 %v283_v56  ;;  %v3097_v15 = vpop.f32.mrf.mxu0  ;;  %v1407_v18 = vmul.f32 %v3069_v44, %v1320_v8 }
 0x12e   :  { %v3099_v17 = vpop.f32.mrf.mxu1  ;;  %v2396_v20 = vpop.eup %2395  ;;  %2421 = vpow2.f32 %v2226_v4  ;;  %1526 = vadd.xlane.f32.xlu0 %v1406_v3  ;;  %v1281_v24 = vmul.f32 %v2394_v14, %v3041_v9  ;;  %v289_v9 = vadd.f32 %v3051_v25, %v3004_v58  ;;  %v2268_v4 = vmul.f32 -1.442695, %v537_v49 }
 0x12f   :  { %v2398_v22 = vpop.eup %2397  ;;  %2423 = vpow2.f32 %v2266_v61  ;;  %1528 = vadd.xlane.f32.xlu1 %v1407_v18  ;;  %v3104_v12 = vpop.f32.mrf.mxu0  ;;  %v1321_v38 = vmul.f32 %v2396_v20, %v3045_v16  ;;  %v535_v18 = vadd.f32 %v3063_v40, %v3004_v58  ;;  %v543_v3 = vadd.f32 %v3088_v7, %v3006_v59 }
 0x130   :  { %v3106_v23 = vpop.f32.mrf.mxu1  ;;  %v2400_v27 = vpop.eup %2399  ;;  %v1044_v28 = vadd.f32 1.0, %v2398_v22  ;;  %2425 = vtanh.f32 %v523_v50  ;;  %v1368_v36 = vmul.f32 %v3069_v44, %v1281_v24 }
 0x131   :  { %v2402_v32 = vpop.eup %2401  ;;  %v1084_v33 = vadd.f32 1.0, %v2400_v27  ;;  %v3109_v57 = vpop.f32.mrf.mxu0  ;;  %v1408_v48 = vmul.f32 %v3069_v44, %v1321_v38  ;;  %v549_v43 = vadd.f32 %v3106_v23, %v3006_v59 }
 0x132   :  { %v3111_v34 = vpop.f32.mrf.mxu1  ;;  %v2404_v42 = vpop.eup %2403  ;;  %2427 = vrcp.f32 %v1044_v28  ;;  %1448 = vadd.xlane.f32.xlu0 %v1367_v37  ;;  %v1282_v52 = vmul.f32 %v2402_v32, %v3047_v21 }
 0x133   :  { %v3119_v45 = vpop.eup %2405  ;;  %2429 = vrcp.f32 %v1084_v33  ;;  %1450 = vadd.xlane.f32.xlu1 %v1368_v36  ;;  %v3125_v51 = vpop.f32.mrf.mxu0  ;;  %v1322_v1 = vmul.f32 %v2404_v42, %v3056_v30  ;;  %v303_v30 = vadd.f32 %v3086_v6, %v3006_v59  ;;  %v2269_v33 = vmul.f32 -1.442695, %v543_v3 }
 0x134   :  { %v3127_v16 = vpop.f32.mrf.mxu1  ;;  %v3130_v25 = vpop.eup %2407  ;;  %2431 = vpow2.f32 %v2227_v29  ;;  %v1369_v26 = vmul.f32 %v3069_v44, %v1282_v52  ;;  %v309_v36 = vadd.f32 %v3104_v12, %v3006_v59 }
 0x135   :  { %v2410_v47 = vpop.eup %2409  ;;  %2433 = vpow2.f32 %v2267_v31  ;;  %v3132_v55 = vpop.f32.mrf.mxu0  ;;  %v1409_v39 = vmul.f32 %v3069_v44, %v1322_v1  ;;  %v2229_v29 = vmul.f32 -1.442695, %v303_v30  ;;  %v307_v30 = vadd.f32 %v3097_v15, %v3004_v58 }
 0x136   :  { %v3134_v56 = vpop.f32.mrf.mxu1  ;;  %v2412_v60 = vpop.eup %2411  ;;  %v1045_v0 = vadd.f32 1.0, %v2410_v47  ;;  %2435 = vtanh.f32 %v289_v9  ;;  %1530 = vadd.xlane.f32.xlu0 %v1408_v48  ;;  %v541_v9 = vadd.f32 %v3080_v63, %v3004_v58 }
 0x137   :  { %v2414_v21 = vpop.eup %2413  ;;  %v1085_v41 = vadd.f32 1.0, %v2412_v60  ;;  %2437 = vtanh.f32 %v529_v46  ;;  %1452 = vadd.xlane.f32.xlu1 %v1369_v26  ;;  %v3139_v61 = vpop.f32.mrf.mxu0 }
 0x138   :  { %v3141_v8 = vpop.f32.mrf.mxu1  ;;  %v2416_v50 = vpop.eup %2415  ;;  %2439 = vrcp.f32 %v1045_v0  ;;  %v1283_v13 = vmul.f32 %v2414_v21, %v3059_v35 }
 0x139   :  { %v3148_v14 = vpop.eup %2417  ;;  %2441 = vrcp.f32 %v1085_v41  ;;  %v3154_v19 = vpop.f32.mrf.mxu0  ;;  %v1323_v7 = vmul.f32 %v2416_v50, %v3084_v5  ;;  %v301_v5 = vadd.f32 %v3078_v62, %v3004_v58  ;;  %v2230_v62 = vmul.f32 -1.442695, %v309_v36 }
 0x13a   :  { %v3156_v20 = vpop.f32.mrf.mxu1  ;;  %v3159_v22 = vpop.eup %2419  ;;  %2443 = vpow2.f32 %v2228_v2  ;;  %v1370_v35 = vmul.f32 %v3069_v44, %v1283_v13  ;;  %v315_v41 = vadd.f32 %v3125_v51, %v3006_v59  ;;  %v547_v13 = vadd.f32 %v3099_v17, %v3004_v58 }
 0x13b   :  { %v2422_v6 = vpop.eup %2421  ;;  %2445 = vpow2.f32 %v2268_v4  ;;  %1532 = vadd.xlane.f32.xlu1 %v1409_v39  ;;  %v3162_v24 = vpop.f32.mrf.mxu0  ;;  %v1410_v46 = vmul.f32 %v3069_v44, %v1323_v7 }
 0x13c   :  { %v3164_v40 = vpop.f32.mrf.mxu1  ;;  %v2424_v27 = vpop.eup %2423  ;;  %v1046_v28 = vadd.f32 1.0, %v2422_v6  ;;  %2447 = vtanh.f32 %v295_v11  ;;  %1454 = vadd.xlane.f32.xlu0 %v1370_v35  ;;  %v2231_v7 = vmul.f32 -1.442695, %v315_v41 }
 0x13d   :  { %v3167_v31 = vpop.eup %2425  ;;  %v1086_v32 = vadd.f32 1.0, %v2424_v27  ;;  %2449 = vtanh.f32 %v535_v18  ;;  %v3171_v37 = vpop.f32.mrf.mxu0  ;;  %v555_v18 = vadd.f32 %v3127_v16, %v3006_v59 }
 0x13e   :  { %v3173_v38 = vpop.f32.mrf.mxu1  ;;  %2451 = vrcp.f32 %v1046_v28 }
 0x13f   :  { %v2428_v42 = vpop.eup %2427  ;;  %2453 = vrcp.f32 %v1086_v32  ;;  %v3182_v12 = vpop.f32.mrf.mxu0 }
 0x140   :  { %v3184_v49 = vpop.f32.mrf.mxu1  ;;  %v2430_v52 = vpop.eup %2429  ;;  %2455 = vpow2.f32 %v2229_v29  ;;  %v1284_v47 = vmul.f32 %v2428_v42, %v3091_v10  ;;  %1534 = vadd.xlane.f32.xlu0 %v1410_v46  ;;  %v2270_v10 = vmul.f32 -1.442695, %v549_v43  ;;  %v313_v43 = vadd.f32 %v3109_v57, %v3004_v58 }
 0x141   :  { %v2432_v26 = vpop.eup %2431  ;;  %2457 = vpow2.f32 %v2269_v33  ;;  %v3187_v48 = vpop.f32.mrf.mxu0  ;;  %v1324_v0 = vmul.f32 %v2430_v52, %v3119_v45  ;;  %v321_v46 = vadd.f32 %v3139_v61, %v3006_v59  ;;  %v553_v52 = vadd.f32 %v3111_v34, %v3004_v58 }
 0x142   :  { %v3189_v63 = vpop.f32.mrf.mxu1  ;;  %v2434_v1 = vpop.eup %2433  ;;  %v1047_v23 = vadd.f32 1.0, %v2432_v26  ;;  %2459 = vtanh.f32 %v301_v5  ;;  %v1371_v60 = vmul.f32 %v3069_v44, %v1284_v47  ;;  %v561_v47 = vadd.f32 %v3141_v8, %v3006_v59 }
 0x143   :  { %v3193_v2 = vpop.eup %2435  ;;  %v1087_v21 = vadd.f32 1.0, %v2434_v1  ;;  %2461 = vtanh.f32 %v541_v9  ;;  %v3197_v4 = vpop.f32.mrf.mxu0  ;;  %v1411_v6 = vmul.f32 %v3069_v44, %v1324_v0 }
 0x144   :  { %v3199_v50 = vpop.f32.mrf.mxu1  ;;  %v3201_v11 = vpop.eup %2437  ;;  %2463 = vrcp.f32 %v1047_v23  ;;  %1456 = vadd.xlane.f32.xlu1 %v1371_v60 }
 0x145   :  { %v2440_v45 = vpop.eup %2439  ;;  %2465 = vrcp.f32 %v1087_v21  ;;  %v3209_v51 = vpop.f32.mrf.mxu0 }
 0x146   :  { %v3211_v3 = vpop.f32.mrf.mxu1  ;;  %v2442_v39 = vpop.eup %2441  ;;  %2467 = vpow2.f32 %v2230_v62  ;;  %v1285_v35 = vmul.f32 %v2440_v45, %v3130_v25  ;;  %v2271_v25 = vmul.f32 -1.442695, %v555_v18  ;;  %v2272_v45 = vmul.f32 -1.442695, %v561_v47 }
 0x147   :  { %v2444_v15 = vpop.eup %2443  ;;  %2469 = vpow2.f32 %v2270_v10  ;;  %v3215_v27 = vpop.f32.mrf.mxu0  ;;  %v1325_v32 = vmul.f32 %v2442_v39, %v3148_v14  ;;  %v2232_v10 = vmul.f32 -1.442695, %v321_v46 }
 0x148   :  { %v3217_v28 = vpop.f32.mrf.mxu1  ;;  %v2446_v17 = vpop.eup %2445  ;;  %v1048_v29 = vadd.f32 1.0, %v2444_v15  ;;  %2471 = vtanh.f32 %v307_v30  ;;  %1536 = vadd.xlane.f32.xlu1 %v1411_v6  ;;  %v1372_v16 = vmul.f32 %v3069_v44, %v1285_v35  ;;  %v319_v6 = vadd.f32 %v3132_v55, %v3004_v58 }
 0x149   :  { %v3221_v33 = vpop.eup %2447  ;;  %v1088_v36 = vadd.f32 1.0, %v2446_v17  ;;  %2473 = vtanh.f32 %v547_v13  ;;  %v3223_v5 = vpop.f32.mrf.mxu0  ;;  %v1412_v23 = vmul.f32 %v3069_v44, %v1325_v32  ;;  %v327_v13 = vadd.f32 %v3162_v24, %v3006_v59 }
 0x14a   :  { %v3225_v42 = vpop.f32.mrf.mxu1  ;;  %v3227_v9 = vpop.eup %2449  ;;  %2475 = vrcp.f32 %v1048_v29  ;;  %1458 = vadd.xlane.f32.xlu0 %v1372_v16  ;;  %v559_v15 = vadd.f32 %v3134_v56, %v3004_v58 }
 0x14b   :  { %v2452_v14 = vpop.eup %2451  ;;  %2477 = vrcp.f32 %v1088_v36  ;;  %v3237_v26 = vpop.f32.mrf.mxu0  ;;  %v2233_v55 = vmul.f32 -1.442695, %v327_v13 }
 0x14c   :  { %v3239_v62 = vpop.f32.mrf.mxu1  ;;  %v2454_v1 = vpop.eup %2453  ;;  %2479 = vpow2.f32 %v2231_v7  ;;  %v1286_v57 = vmul.f32 %v2452_v14, %v3159_v22  ;;  %v567_v7 = vadd.f32 %v3164_v40, %v3006_v59 }
 0x14d   :  { %v2456_v61 = vpop.eup %2455  ;;  %2481 = vpow2.f32 %v2271_v25  ;;  %v3243_v60 = vpop.f32.mrf.mxu0  ;;  %v3248_v34 = vmul.f32 %v2454_v1, %v3167_v31 }
 0x14e   :  { %v3245_v0 = vpop.f32.mrf.mxu1  ;;  %v2458_v8 = vpop.eup %2457  ;;  %v1049_v21 = vadd.f32 1.0, %v2456_v61  ;;  %2483 = vtanh.f32 %v313_v43  ;;  %v1373_v41 = vmul.f32 %v3069_v44, %v1286_v57  ;;  %1538 = vadd.xlane.f32.xlu0 %v1412_v23  ;;  %v2273_v47 = vmul.f32 -1.442695, %v567_v7 }
 0x14f   :  { %v3251_v30 = vpop.eup %2459  ;;  %v1089_v22 = vadd.f32 1.0, %v2458_v8  ;;  %2485 = vtanh.f32 %v553_v52  ;;  %v3255_v18 = vpop.f32.mrf.mxu0  ;;  %v325_v61 = vadd.f32 %v3154_v19, %v3004_v58  ;;  %v565_v8 = vadd.f32 %v3156_v20, %v3004_v58 }
 0x150   :  { %v3257_v39 = vpop.f32.mrf.mxu1  ;;  %v3259_v31 = vpop.eup %2461  ;;  %2487 = vrcp.f32 %v1049_v21  ;;  %1460 = vadd.xlane.f32.xlu1 %v1373_v41  ;;  %v573_v21 = vadd.f32 %v3184_v49, %v3006_v59 }
 0x151   :  { %v2464_v35 = vpop.eup %2463  ;;  %2489 = vrcp.f32 %v1089_v22  ;;  %v3267_v24 = vpop.f32.mrf.mxu0 }
 0x152   :  { %v3269_v17 = vpop.f32.mrf.mxu1  ;;  %v2466_v29 = vpop.eup %2465  ;;  %2491 = vpow2.f32 %v2232_v10  ;;  %v1287_v16 = vmul.f32 %v2464_v35, %v3193_v2  ;;  %v333_v2 = vadd.f32 %v3182_v12, %v3006_v59 }
 0x153   :  { %v2468_v32 = vpop.eup %2467  ;;  %2493 = vpow2.f32 %v2272_v45  ;;  %v3272_v36 = vpop.f32.mrf.mxu0  ;;  %v1327_v46 = vmul.f32 %v2466_v29, %v3201_v11 }
 0x154   :  { %v3274_v25 = vpop.f32.mrf.mxu1  ;;  %v2470_v43 = vpop.eup %2469  ;;  %v1050_v56 = vadd.f32 1.0, %v2468_v32  ;;  %2495 = vtanh.f32 %v319_v6  ;;  %v1374_v40 = vmul.f32 %v3069_v44, %v1287_v16  ;;  %v2234_v13 = vmul.f32 -1.442695, %v333_v2 }
 0x155   :  { %v3278_v14 = vpop.eup %2471  ;;  %v1090_v52 = vadd.f32 1.0, %v2470_v43  ;;  %2497 = vtanh.f32 %v559_v15  ;;  %v3282_v1 = vpop.f32.mrf.mxu0  ;;  %v1414_v45 = vmul.f32 %v3069_v44, %v1327_v46  ;;  %v2274_v16 = vmul.f32 -1.442695, %v573_v21 }
 0x156   :  { %v3284_v57 = vpop.f32.mrf.mxu1  ;;  %v3286_v23 = vpop.eup %2473  ;;  %2499 = vrcp.f32 %v1050_v56  ;;  %1462 = vadd.xlane.f32.xlu0 %v1374_v40  ;;  %v339_v32 = vadd.f32 %v3197_v4, %v3006_v59  ;;  %v331_v56 = vadd.f32 %v3171_v37, %v3004_v58  ;;  %v571_v40 = vadd.f32 %v3173_v38, %v3004_v58 }
 0x157   :  { %v2476_v11 = vpop.eup %2475  ;;  %2501 = vrcp.f32 %v1090_v52  ;;  %v3294_v12 = vpop.f32.mrf.mxu0  ;;  %v579_v46 = vadd.f32 %v3199_v50, %v3006_v59 }
 0x158   :  { %v3296_v10 = vpop.f32.mrf.mxu1  ;;  %v2478_v41 = vpop.eup %2477  ;;  %2503 = vpow2.f32 %v2233_v55  ;;  %v1288_v22 = vmul.f32 %v2476_v11, %v3221_v33  ;;  %v2235_v11 = vmul.f32 -1.442695, %v339_v32 }
 0x159   :  { %v2480_v19 = vpop.eup %2479  ;;  %2505 = vpow2.f32 %v2273_v47  ;;  %v3300_v6 = vpop.f32.mrf.mxu0  ;;  %v1328_v15 = vmul.f32 %v2478_v41, %v3227_v9 }
 0x15a   :  { %v2482_v35 = vpop.eup %2481  ;;  %v1051_v20 = vadd.f32 1.0, %v2480_v19  ;;  %2507 = vtanh.f32 %v325_v61  ;;  %v1375_v49 = vmul.f32 %v3069_v44, %v1288_v22  ;;  %1542 = vadd.xlane.f32.xlu0 %v1414_v45  ;;  %v3304_v7 = vpop.f32.mrf.mxu1  ;;  %v345_v19 = vadd.f32 %v3215_v27, %v3006_v59 }
 0x15b   :  { %v3306_v29 = vpop.eup %2483  ;;  %v1091_v33 = vadd.f32 1.0, %v2482_v35  ;;  %2509 = vtanh.f32 %v565_v8  ;;  %v3310_v55 = vpop.f32.mrf.mxu0  ;;  %v1415_v47 = vmul.f32 %v3069_v44, %v1328_v15  ;;  %v577_v15 = vadd.f32 %v3189_v63, %v3004_v58 }
 0x15c   :  { %v3312_v43 = vpop.eup %2485  ;;  %2511 = vrcp.f32 %v1051_v20  ;;  %1464 = vadd.xlane.f32.xlu1 %v1375_v49  ;;  %v3324_v61 = vpop.f32.mrf.mxu1  ;;  %v337_v20 = vadd.f32 %v3187_v48, %v3004_v58 }
 0x15d   :  { %v2488_v9 = vpop.eup %2487  ;;  %2513 = vrcp.f32 %v1091_v33  ;;  %v3320_v52 = vpop.f32.mrf.mxu0  ;;  %v585_v33 = vadd.f32 %v3217_v28, %v3006_v59 }
 0x15e   :  { %v2490_v4 = vpop.eup %2489  ;;  %2515 = vpow2.f32 %v2234_v13  ;;  %v1289_v2 = vmul.f32 %v2488_v9, %v3251_v30  ;;  %v2275_v30 = vmul.f32 -1.442695, %v579_v46  ;;  %v3340_v49 = vpop.f32.mrf.mxu1  ;;  %v2236_v9 = vmul.f32 -1.442695, %v345_v19 }
 0x15f   :  { %v2492_v37 = vpop.eup %2491  ;;  %2517 = vpow2.f32 %v2274_v16  ;;  %v3326_v8 = vpop.f32.mrf.mxu0  ;;  %v1329_v41 = vmul.f32 %v2490_v4, %v3259_v31 }
 0x160   :  { %v2494_v21 = vpop.eup %2493  ;;  %v1052_v38 = vadd.f32 1.0, %v2492_v37  ;;  %2519 = vtanh.f32 %v331_v56  ;;  %1544 = vadd.xlane.f32.xlu1 %v1415_v47  ;;  %v1376_v50 = vmul.f32 %v3069_v44, %v1289_v2  ;;  %v3352_v28 = vpop.f32.mrf.mxu1 }
 0x161   :  { %v3330_v22 = vpop.eup %2495  ;;  %v1092_v45 = vadd.f32 1.0, %v2494_v21  ;;  %2521 = vtanh.f32 %v571_v40  ;;  %v3334_v13 = vpop.f32.mrf.mxu0  ;;  %v1416_v56 = vmul.f32 %v3069_v44, %v1329_v41  ;;  %v343_v21 = vadd.f32 %v3209_v51, %v3004_v58 }
 0x162   :  { %v3336_v35 = vpop.eup %2497  ;;  %2523 = vrcp.f32 %v1052_v38  ;;  %1466 = vadd.xlane.f32.xlu0 %v1376_v50  ;;  %v351_v38 = vadd.f32 %v3237_v26, %v3006_v59  ;;  %v583_v50 = vadd.f32 %v3211_v3, %v3004_v58  ;;  %v591_v41 = vadd.f32 %v3239_v62, %v3006_v59 }
 0x163   :  { %v2500_v31 = vpop.eup %2499  ;;  %2525 = vrcp.f32 %v1092_v45  ;;  %v3346_v27 = vpop.f32.mrf.mxu0 }
 0x164   :  { %v2502_v16 = vpop.eup %2501  ;;  %2527 = vpow2.f32 %v2235_v11  ;;  %v1290_v32 = vmul.f32 %v2500_v31, %v3278_v14  ;;  %v2276_v14 = vmul.f32 -1.442695, %v585_v33  ;;  %v2237_v3 = vmul.f32 -1.442695, %v351_v38 }
 0x165   :  { %v2504_v48 = vpop.eup %2503  ;;  %2529 = vpow2.f32 %v2275_v30  ;;  %v1330_v63 = vmul.f32 %v2502_v16, %v3286_v23  ;;  %v3356_v37 = vpop.f32.mrf.mxu0 }
 0x166   :  { %v2506_v40 = vpop.eup %2505  ;;  %v1053_v46 = vadd.f32 1.0, %v2504_v48  ;;  %2531 = vtanh.f32 %v337_v20  ;;  %v1377_v4 = vmul.f32 %v3069_v44, %v1290_v32  ;;  %1546 = vadd.xlane.f32.xlu0 %v1416_v56  ;;  %v3370_v20 = vpop.f32.mrf.mxu1  ;;  %v357_v56 = vadd.f32 %v3255_v18, %v3006_v59 }
 0x167   :  { %v3354_v47 = vpop.eup %2507  ;;  %v1093_v2 = vadd.f32 1.0, %v2506_v40  ;;  %2533 = vtanh.f32 %v577_v15  ;;  %v1417_v30 = vmul.f32 %v3069_v44, %v1330_v63  ;;  %v3373_v31 = vpop.f32.mrf.mxu0  ;;  %v597_v63 = vadd.f32 %v3257_v39, %v3006_v59 }
 0x168   :  { %v3358_v11 = vpop.eup %2509  ;;  %2535 = vrcp.f32 %v1053_v46  ;;  %1468 = vadd.xlane.f32.xlu1 %v1377_v4  ;;  %v3385_v40 = vpop.f32.mrf.mxu1  ;;  %v589_v4 = vadd.f32 %v3225_v42, %v3004_v58 }
 0x169   :  { %v2512_v23 = vpop.eup %2511  ;;  %2537 = vrcp.f32 %v1093_v2  ;;  %v3391_v18 = vpop.f32.mrf.mxu0 }
 0x16a   :  { %v2514_v45 = vpop.eup %2513  ;;  %2539 = vpow2.f32 %v2236_v9  ;;  %v1291_v19 = vmul.f32 %v2512_v23, %v3306_v29  ;;  %v2277_v29 = vmul.f32 -1.442695, %v591_v41  ;;  %v3395_v41 = vpop.f32.mrf.mxu1 }
 0x16b   :  { %v2516_v51 = vpop.eup %2515  ;;  %2541 = vpow2.f32 %v2276_v14  ;;  %v1331_v26 = vmul.f32 %v2514_v45, %v3312_v43  ;;  %v349_v43 = vadd.f32 %v3223_v5, %v3004_v58 }
 0x16c   :  { %v2518_v15 = vpop.eup %2517  ;;  %v1054_v33 = vadd.f32 1.0, %v2516_v51  ;;  %2543 = vtanh.f32 %v343_v21  ;;  %1548 = vadd.xlane.f32.xlu1 %v1417_v30  ;;  %v1378_v62 = vmul.f32 %v3069_v44, %v1291_v19  ;;  %v2238_v21 = vmul.f32 -1.442695, %v357_v56  ;;  %v3400_v19 = vpop.f32.mrf.mxu0 }
 0x16d   :  { %v3376_v16 = vpop.eup %2519  ;;  %v1094_v32 = vadd.f32 1.0, %v2518_v15  ;;  %2545 = vtanh.f32 %v583_v50  ;;  %v1418_v9 = vmul.f32 %v3069_v44, %v1331_v26  ;;  %v2278_v30 = vmul.f32 -1.442695, %v597_v63 }
 0x16e   :  { %v3380_v48 = vpop.eup %2521  ;;  %2547 = vrcp.f32 %v1054_v33  ;;  %1470 = vadd.xlane.f32.xlu0 %v1378_v62  ;;  %v355_v51 = vadd.f32 %v3243_v60, %v3004_v58  ;;  %v363_v26 = vadd.f32 %v3272_v36, %v3006_v59  ;;  %v603_v33 = vadd.f32 %v3274_v25, %v3006_v59  ;;  %v3417_v56 = vpop.f32.mrf.mxu0 }
 0x16f   :  { %v2524_v46 = vpop.eup %2523  ;;  %2549 = vrcp.f32 %v1094_v32  ;;  %v369_v63 = vadd.f32 %v3294_v12, %v3006_v59 }
 0x170   :  { %v2526_v2 = vpop.eup %2525  ;;  %2551 = vpow2.f32 %v2237_v3  ;;  %1550 = vadd.xlane.f32.xlu1 %v1418_v9  ;;  %v1292_v5 = vmul.f32 %v2524_v46, %v3330_v22  ;;  %v3435_v12 = vpop.f32.mrf.mxu0 }
 0x171   :  { %v2528_v14 = vpop.eup %2527  ;;  %2553 = vpow2.f32 %v2277_v29  ;;  %v1332_v42 = vmul.f32 %v2526_v2, %v3336_v35  ;;  %v595_v35 = vadd.f32 %v3245_v0, %v3004_v58  ;;  %v3414_v29 = vpop.f32.mrf.mxu1  ;;  %v2239_v0 = vmul.f32 -1.442695, %v363_v26 }
 0x172   :  { %v2530_v38 = vpop.eup %2529  ;;  %v1055_v23 = vadd.f32 1.0, %v2528_v14  ;;  %2555 = vtanh.f32 %v349_v43  ;;  %v1379_v50 = vmul.f32 %v3069_v44, %v1292_v5  ;;  %v609_v5 = vadd.f32 %v3296_v10, %v3006_v59 }
 0x173   :  { %v3398_v39 = vpop.eup %2531  ;;  %v1095_v45 = vadd.f32 1.0, %v2530_v38  ;;  %2557 = vtanh.f32 %v589_v4  ;;  %v1419_v32 = vmul.f32 %v3069_v44, %v1332_v42  ;;  %v2279_v4 = vmul.f32 -1.442695, %v603_v33  ;;  %v3430_v14 = vpop.f32.mrf.mxu1 }
 0x174   :  { %v3402_v22 = vpop.eup %2533  ;;  %2559 = vrcp.f32 %v1055_v23  ;;  %1472 = vadd.xlane.f32.xlu1 %v1379_v50  ;;  %v601_v23 = vadd.f32 %v3269_v17, %v3004_v58  ;;  %v2240_v10 = vmul.f32 -1.442695, %v369_v63  ;;  %v2280_v26 = vmul.f32 -1.442695, %v609_v5 }
 0x175   :  { %v2536_v15 = vpop.eup %2535  ;;  %2561 = vrcp.f32 %v1095_v45 }
 0x176   :  { %v2538_v3 = vpop.eup %2537  ;;  %2563 = vpow2.f32 %v2238_v21  ;;  %v1293_v62 = vmul.f32 %v2536_v15, %v3354_v47  ;;  %v3439_v15 = vpop.f32.mrf.mxu1 }
 0x177   :  { %v2540_v60 = vpop.eup %2539  ;;  %2565 = vpow2.f32 %v2278_v30  ;;  %v1333_v36 = vmul.f32 %v2538_v3, %v3358_v11  ;;  %v361_v11 = vadd.f32 %v3267_v24, %v3004_v58 }
 0x178   :  { %v2542_v43 = vpop.eup %2541  ;;  %v1056_v9 = vadd.f32 1.0, %v2540_v60  ;;  %2567 = vtanh.f32 %v355_v51  ;;  %v1380_v25 = vmul.f32 %v3069_v44, %v1293_v62  ;;  %1552 = vadd.xlane.f32.xlu1 %v1419_v32  ;;  %v3447_v62 = vpop.f32.mrf.mxu0  ;;  %v367_v32 = vadd.f32 %v3282_v1, %v3004_v58 }
 0x179   :  { %v3420_v46 = vpop.eup %2543  ;;  %v1096_v47 = vadd.f32 1.0, %v2542_v43  ;;  %2569 = vtanh.f32 %v595_v35  ;;  %v1420_v21 = vmul.f32 %v3069_v44, %v1333_v36  ;;  %v607_v36 = vadd.f32 %v3284_v57, %v3004_v58 }
 0x17a   :  { %v3424_v2 = vpop.eup %2545  ;;  %2571 = vrcp.f32 %v1056_v9  ;;  %1474 = vadd.xlane.f32.xlu0 %v1380_v25  ;;  %v615_v43 = vadd.f32 %v3324_v61, %v3006_v59  ;;  %v3460_v1 = vpop.f32.mrf.mxu0 }
 0x17b   :  { %v2548_v38 = vpop.eup %2547  ;;  %2573 = vrcp.f32 %v1096_v47 }
 0x17c   :  { %v2550_v50 = vpop.eup %2549  ;;  %2575 = vpow2.f32 %v2239_v0  ;;  %1554 = vadd.xlane.f32.xlu1 %v1420_v21  ;;  %v1294_v24 = vmul.f32 %v2548_v38, %v3376_v16  ;;  %v375_v16 = vadd.f32 %v3310_v55, %v3006_v59  ;;  %v3458_v0 = vpop.f32.mrf.mxu1  ;;  %v2281_v21 = vmul.f32 -1.442695, %v615_v43 }
 0x17d   :  { %v2552_v42 = vpop.eup %2551  ;;  %2577 = vpow2.f32 %v2279_v4  ;;  %v1334_v45 = vmul.f32 %v2550_v50, %v3380_v48  ;;  %v379_v43 = vadd.f32 %v3320_v52, %v3004_v58 }
 0x17e   :  { %v2554_v30 = vpop.eup %2553  ;;  %v1057_v51 = vadd.f32 1.0, %v2552_v42  ;;  %2579 = vtanh.f32 %v361_v11  ;;  %v1381_v17 = vmul.f32 %v3069_v44, %v1294_v24  ;;  %v2241_v47 = vmul.f32 -1.442695, %v375_v16  ;;  %v3472_v50 = vpop.f32.mrf.mxu1 }
 0x17f   :  { %v3442_v35 = vpop.eup %2555  ;;  %v1097_v33 = vadd.f32 1.0, %v2554_v30  ;;  %2581 = vtanh.f32 %v601_v23  ;;  %v1421_v3 = vmul.f32 %v3069_v44, %v1334_v45  ;;  %v373_v23 = vadd.f32 %v3300_v6, %v3004_v58 }
 0x180   :  { %v3449_v48 = vpop.eup %2557  ;;  %2583 = vrcp.f32 %v1057_v51  ;;  %1476 = vadd.xlane.f32.xlu1 %v1381_v17  ;;  %v621_v42 = vadd.f32 %v3352_v28, %v3006_v59 }
 0x181   :  { %v2560_v60 = vpop.eup %2559  ;;  %2585 = vrcp.f32 %v1097_v33  ;;  %1556 = vadd.xlane.f32.xlu0 %v1421_v3  ;;  %v3482_v33 = vpop.f32.mrf.mxu1 }
 0x182   :  { %v2562_v55 = vpop.eup %2561  ;;  %2587 = vpow2.f32 %v2240_v10  ;;  %v1295_v9 = vmul.f32 %v2560_v60, %v3398_v39  ;;  %v381_v39 = vadd.f32 %v3326_v8, %v3006_v59  ;;  %v3478_v10 = vpop.f32.mrf.mxu0 }
 0x183   :  { %v2564_v25 = vpop.eup %2563  ;;  %2589 = vpow2.f32 %v2280_v26  ;;  %v1335_v11 = vmul.f32 %v2562_v55, %v3402_v22  ;;  %v613_v22 = vadd.f32 %v3304_v7, %v3004_v58  ;;  %v627_v55 = vadd.f32 %v3385_v40, %v3006_v59 }
 0x184   :  { %v2566_v4 = vpop.eup %2565  ;;  %v1058_v63 = vadd.f32 1.0, %v2564_v25  ;;  %2591 = vtanh.f32 %v367_v32  ;;  %v1382_v57 = vmul.f32 %v3069_v44, %v1295_v9  ;;  %v2242_v51 = vmul.f32 -1.442695, %v381_v39  ;;  %v3490_v60 = vpop.f32.mrf.mxu0 }
 0x185   :  { %v3464_v61 = vpop.eup %2567  ;;  %v1098_v5 = vadd.f32 1.0, %v2566_v4  ;;  %2593 = vtanh.f32 %v607_v36  ;;  %v1422_v45 = vmul.f32 %v3069_v44, %v1335_v11  ;;  %v2282_v32 = vmul.f32 -1.442695, %v621_v42  ;;  %v3501_v25 = vpop.f32.mrf.mxu1 }
 0x186   :  { %v3468_v38 = vpop.eup %2569  ;;  %2595 = vrcp.f32 %v1058_v63  ;;  %1478 = vadd.xlane.f32.xlu0 %v1382_v57  ;;  %v2283_v39 = vmul.f32 -1.442695, %v627_v55 }
 0x187   :  { %v2572_v24 = vpop.eup %2571  ;;  %2597 = vrcp.f32 %v1098_v5  ;;  %v3521_v42 = vpop.f32.mrf.mxu1 }
 0x188   :  { %v2574_v8 = vpop.eup %2573  ;;  %2599 = vpow2.f32 %v2241_v47  ;;  %v1296_v30 = vmul.f32 %v2572_v24, %v3420_v46  ;;  %v387_v46 = vadd.f32 %v3346_v27, %v3006_v59  ;;  %v3506_v47 = vld [vmem:[%s4197_s3] ss:$0 sm:$0xff]  ;;  %v385_v24 = vadd.f32 %v3334_v13, %v3004_v58 }
 0x189   :  { %v2576_v6 = vpop.eup %2575  ;;  %2601 = vpow2.f32 %v2281_v21  ;;  %v1336_v28 = vmul.f32 %v2574_v8, %v3424_v2  ;;  %v619_v2 = vadd.f32 %v3340_v49, %v3004_v58  ;;  %v3509_v49 = vpop.f32.mrf.mxu0 }
 0x18a   :  { %v2578_v26 = vpop.eup %2577  ;;  %v1059_v17 = vadd.f32 1.0, %v2576_v6  ;;  %2603 = vtanh.f32 %v373_v23  ;;  %1558 = vadd.xlane.f32.xlu0 %v1422_v45  ;;  %v1383_v7 = vmul.f32 %v3069_v44, %v1296_v30  ;;  %v2243_v63 = vmul.f32 -1.442695, %v387_v46 }
 0x18b   :  { %v3486_v16 = vpop.eup %2579  ;;  %v1099_v3 = vadd.f32 1.0, %v2578_v26  ;;  %2605 = vtanh.f32 %v613_v22  ;;  %v1423_v52 = vmul.f32 %v3506_v47, %v1336_v28  ;;  %v393_v22 = vadd.f32 %v3373_v31, %v3006_v59  ;;  %v3527_v30 = vpop.f32.mrf.mxu0 }
 0x18c   :  { %v3492_v36 = vpop.eup %2581  ;;  %2607 = vrcp.f32 %v1059_v17  ;;  %1480 = vadd.xlane.f32.xlu1 %v1383_v7  ;;  %v633_v45 = vadd.f32 %v3414_v29, %v3006_v59 }
 0x18d   :  { %v2584_v44 = vpop.eup %2583  ;;  %2609 = vrcp.f32 %v1099_v3  ;;  %v2244_v28 = vmul.f32 -1.442695, %v393_v22  ;;  %v405_v22 = vadd.f32 %v3435_v12, %v3006_v59 }
 0x18e   :  { %v2586_v9 = vpop.eup %2585  ;;  %2611 = vpow2.f32 %v2242_v51  ;;  %v1297_v27 = vmul.f32 %v2584_v44, %v3442_v35  ;;  %v2284_v46 = vmul.f32 -1.442695, %v633_v45  ;;  %v391_v44 = vadd.f32 %v3356_v37, %v3004_v58 }
 0x18f   :  { %v2588_v4 = vpop.eup %2587  ;;  %2613 = vpow2.f32 %v2282_v32  ;;  %v1337_v35 = vmul.f32 %v2586_v9, %v3449_v48  ;;  %v625_v48 = vadd.f32 %v3370_v20, %v3004_v58  ;;  %v3532_v20 = vpop.f32.mrf.mxu1  ;;  %v631_v9 = vadd.f32 %v3395_v41, %v3004_v58 }
 0x190   :  { %v2590_v57 = vpop.eup %2589  ;;  %v1060_v40 = vadd.f32 1.0, %v2588_v4  ;;  %2615 = vtanh.f32 %v379_v43  ;;  %v1384_v11 = vmul.f32 %v3506_v47, %v1297_v27  ;;  %1560 = vadd.xlane.f32.xlu1 %v1423_v52  ;;  %v3539_v43 = vpop.f32.mrf.mxu0  ;;  %v639_v27 = vadd.f32 %v3439_v15, %v3006_v59 }
 0x191   :  { %v3513_v5 = vpop.eup %2591  ;;  %v1100_v21 = vadd.f32 1.0, %v2590_v57  ;;  %2617 = vtanh.f32 %v619_v2  ;;  %v1424_v13 = vmul.f32 %v3506_v47, %v1337_v35  ;;  %v3550_v52 = vpop.f32.mrf.mxu1  ;;  %v645_v45 = vadd.f32 %v3472_v50, %v3006_v59 }
 0x192   :  { %v3515_v23 = vpop.eup %2593  ;;  %2619 = vrcp.f32 %v1060_v40  ;;  %1482 = vadd.xlane.f32.xlu0 %v1384_v11  ;;  %v3553_v57 = vpop.f32.mrf.mxu0 }
 0x193   :  { %v2596_v8 = vpop.eup %2595  ;;  %2621 = vrcp.f32 %v1100_v21 }
 0x194   :  { %v2598_v6 = vpop.eup %2597  ;;  %2623 = vpow2.f32 %v2243_v63  ;;  %v1298_v51 = vmul.f32 %v2596_v8, %v3464_v61  ;;  %v399_v61 = vadd.f32 %v3400_v19, %v3006_v59  ;;  %v3565_v8 = vpop.f32.mrf.mxu1 }
 0x195   :  { %v2600_v31 = vpop.eup %2599  ;;  %2625 = vpow2.f32 %v2283_v39  ;;  %v1338_v26 = vmul.f32 %v2598_v6, %v3468_v38  ;;  %v2285_v39 = vmul.f32 -1.442695, %v639_v27  ;;  %v3571_v6 = vpop.f32.mrf.mxu0 }
 0x196   :  { %v2602_v17 = vpop.eup %2601  ;;  %v1061_v7 = vadd.f32 1.0, %v2600_v31  ;;  %2627 = vtanh.f32 %v385_v24  ;;  %1562 = vadd.xlane.f32.xlu0 %v1424_v13  ;;  %v1385_v29 = vmul.f32 %v3506_v47, %v1298_v51  ;;  %v2245_v37 = vmul.f32 -1.442695, %v399_v61 }
 0x197   :  { %v3535_v3 = vpop.eup %2603  ;;  %v1101_v32 = vadd.f32 1.0, %v2602_v17  ;;  %2629 = vtanh.f32 %v625_v48  ;;  %v1425_v2 = vmul.f32 %v3506_v47, %v1338_v26  ;;  %v411_v61 = vadd.f32 %v3460_v1, %v3006_v59 }
 0x198   :  { %v3541_v38 = vpop.eup %2605  ;;  %2631 = vrcp.f32 %v1061_v7  ;;  %1484 = vadd.xlane.f32.xlu1 %v1385_v29  ;;  %v2246_v7 = vmul.f32 -1.442695, %v405_v22  ;;  %v649_v22 = vadd.f32 %v3482_v33, %v3004_v58 }
 0x199   :  { %v2608_v55 = vpop.eup %2607  ;;  %2633 = vrcp.f32 %v1101_v32  ;;  %v3581_v32 = vpop.f32.mrf.mxu0 }
 0x19a   :  { %v2610_v19 = vpop.eup %2609  ;;  %2635 = vpow2.f32 %v2244_v28  ;;  %1564 = vadd.xlane.f32.xlu0 %v1425_v2  ;;  %v1299_v4 = vmul.f32 %v2608_v55, %v3486_v16  ;;  %v397_v16 = vadd.f32 %v3391_v18, %v3004_v58  ;;  %v643_v55 = vadd.f32 %v3458_v0, %v3004_v58 }
 0x19b   :  { %v2612_v63 = vpop.eup %2611  ;;  %2637 = vpow2.f32 %v2284_v46  ;;  %v1339_v35 = vmul.f32 %v2610_v19, %v3492_v36  ;;  %v637_v36 = vadd.f32 %v3430_v14, %v3004_v58  ;;  %v3576_v14 = vpop.f32.mrf.mxu1  ;;  %v2247_v0 = vmul.f32 -1.442695, %v411_v61 }
 0x19c   :  { %v2614_v40 = vpop.eup %2613  ;;  %v1062_v11 = vadd.f32 1.0, %v2612_v63  ;;  %2639 = vtanh.f32 %v391_v44  ;;  %v1386_v41 = vmul.f32 %v3506_v47, %v1299_v4  ;;  %v3597_v1 = vpop.f32.mrf.mxu0 }
 0x19d   :  { %v3557_v15 = vpop.eup %2615  ;;  %v1102_v21 = vadd.f32 1.0, %v2614_v40  ;;  %2641 = vtanh.f32 %v631_v9  ;;  %v1426_v51 = vmul.f32 %v3506_v47, %v1339_v35  ;;  %v651_v9 = vadd.f32 %v3501_v25, %v3006_v59  ;;  %v3594_v19 = vpop.f32.mrf.mxu1 }
 0x19e   :  { %v3559_v24 = vpop.eup %2617  ;;  %2643 = vrcp.f32 %v1062_v11  ;;  %1486 = vadd.xlane.f32.xlu0 %v1386_v41 }
 0x19f   :  { %v2620_v48 = vpop.eup %2619  ;;  %2645 = vrcp.f32 %v1102_v21  ;;  %v2287_v35 = vmul.f32 -1.442695, %v651_v9  ;;  %v3650_v9 = vpop.permute.xlu1 %1613 }
 0x1a0   :  { %v2622_v13 = vpop.eup %2621  ;;  %2647 = vpow2.f32 %v2245_v37  ;;  %v1300_v18 = vmul.f32 %v2620_v48, %v3513_v5  ;;  %v2286_v5 = vmul.f32 -1.442695, %v645_v45  ;;  %v657_v48 = vadd.f32 %v3532_v20, %v3006_v59 }
 0x1a1   :  { %v2624_v12 = vpop.eup %2623  ;;  %2649 = vpow2.f32 %v2285_v39  ;;  %v1340_v31 = vmul.f32 %v2622_v13, %v3515_v23  ;;  %v403_v23 = vadd.f32 %v3417_v56, %v3004_v58  ;;  %v3611_v39 = vpop.f32.mrf.mxu1  ;;  %v663_v20 = vadd.f32 %v3565_v8, %v3006_v59 }
 0x1a2   :  { %v2626_v26 = vpop.eup %2625  ;;  %v1063_v17 = vadd.f32 1.0, %v2624_v12  ;;  %2651 = vtanh.f32 %v397_v16  ;;  %v1387_v50 = vmul.f32 %v3506_v47, %v1300_v18  ;;  %1566 = vadd.xlane.f32.xlu0 %v1426_v51  ;;  %v423_v18 = vadd.f32 %v3527_v30, %v3006_v59 }
 0x1a3   :  { %v3579_v28 = vpop.eup %2627  ;;  %v1103_v29 = vadd.f32 1.0, %v2626_v26  ;;  %2653 = vtanh.f32 %v637_v36  ;;  %v1427_v44 = vmul.f32 %v3506_v47, %v1340_v31  ;;  %v3617_v36 = vpop.f32.mrf.mxu0  ;;  %v421_v8 = vadd.f32 %v3509_v49, %v3004_v58 }
 0x1a4   :  { %v3583_v46 = vpop.eup %2629  ;;  %2655 = vrcp.f32 %v1063_v17  ;;  %1488 = vadd.xlane.f32.xlu1 %v1387_v50  ;;  %v674_v31 = vpop.f32.mrf.mxu1  ;;  %v2249_v61 = vmul.f32 -1.442695, %v423_v18 }
 0x1a5   :  { %v2632_v2 = vpop.eup %2631  ;;  %2657 = vrcp.f32 %v1103_v29  ;;  %v3630_v50 = vpop.f32.mrf.mxu0  ;;  %v655_v29 = vadd.f32 %v3521_v42, %v3004_v58 }
 0x1a6   :  { %v2634_v27 = vpop.eup %2633  ;;  %2659 = vpow2.f32 %v2246_v7  ;;  %1568 = vadd.xlane.f32.xlu0 %v1427_v44  ;;  %v1301_v56 = vmul.f32 %v2632_v2, %v3535_v3  ;;  %v417_v3 = vadd.f32 %v3490_v60, %v3006_v59  ;;  %v2288_v7 = vmul.f32 -1.442695, %v657_v48  ;;  %v3647_v42 = vpop.f32.mrf.mxu1 }
 0x1a7   :  { %v2636_v4 = vpop.eup %2635  ;;  %2661 = vpow2.f32 %v2286_v5  ;;  %v3600_v63 = vmul.f32 %v2634_v27, %v3541_v38  ;;  %v409_v38 = vadd.f32 %v3447_v62, %v3004_v58  ;;  %v3643_v44 = vand.u32 127, %v164_v53 }
 0x1a8   :  { %v2638_v37 = vpop.eup %2637  ;;  %v1064_v40 = vadd.f32 1.0, %v2636_v4  ;;  %2663 = vtanh.f32 %v403_v23  ;;  %v1388_v25 = vmul.f32 %v3506_v47, %v1301_v56  ;;  %v2248_v62 = vmul.f32 -1.442695, %v417_v3  ;;  %v3657_v4 = vpop.f32.mrf.mxu0 }
 0x1a9   :  { %v3603_v11 = vpop.eup %2639  ;;  %v1104_v41 = vadd.f32 1.0, %v2638_v37  ;;  %2665 = vtanh.f32 %v643_v55  ;;  %v661_v23 = vadd.f32 %v3550_v52, %v3004_v58  ;;  %v2289_v55 = vmul.f32 -1.442695, %v663_v20 }
 0x1aa   :  { %v3607_v21 = vpop.eup %2641  ;;  %2667 = vrcp.f32 %v1064_v40  ;;  %1490 = vadd.xlane.f32.xlu0 %v1388_v25  ;;  %v669_v52 = vadd.f32 %v3594_v19, %v3006_v59  ;;  %v435_v53 = vadd.f32 %v3581_v32, %v3006_v59  ;;  %v1782_v32 = vadd.s32 4294967288, %v3643_v44 }
 0x1ab   :  { %v2644_v16 = vpop.eup %2643  ;;  %2669 = vrcp.f32 %v1104_v41  ;;  %v3673_v3 = vadd.f32 %v3576_v14, %v3004_v58 }
 0x1ac   :  { %v2646_v60 = vpop.eup %2645  ;;  %2671 = vpow2.f32 %v2247_v0  ;;  %v1302_v45 = vmul.f32 %v2644_v16, %v3557_v15  ;;  %v1789_v0 = vadd.s32 4294967280, %v3643_v44  ;;  %v3677_v16 = vsub.s32 %v3643_v44, %v2997_v54 }
 0x1ad   :  { %v2648_v13 = vpop.eup %2647  ;;  %2673 = vpow2.f32 %v2287_v35  ;;  %v3623_v51 = vmul.f32 %v2646_v60, %v3559_v24  ;;  %v415_v24 = vadd.f32 %v3478_v10, %v3004_v58  ;;  %v429_v10 = vadd.f32 %v3553_v57, %v3006_v59 }
 0x1ae   :  { %v2650_v12 = vpop.eup %2649  ;;  %v1065_v33 = vadd.f32 1.0, %v2648_v13  ;;  %2675 = vtanh.f32 %v409_v38  ;;  %v1389_v26 = vmul.f32 %v3506_v47, %v1302_v45  ;;  %v680_v38 = vpop.f32.mrf.mxu1  ;;  %v2290_v60 = vmul.f32 -1.442695, %v669_v52 }
 0x1af   :  { %v3628_v17 = vpop.eup %2651  ;;  %v1105_v15 = vadd.f32 1.0, %v2650_v12  ;;  %2677 = vtanh.f32 %v649_v22  ;;  %v2250_v48 = vmul.f32 -1.442695, %v429_v10  ;;  %v3681_v45 = vadd.f32 %v3571_v6, %v3004_v58 }
 0x1b0   :  { %v3632_v30 = vpop.eup %2653  ;;  %2679 = vrcp.f32 %v1065_v33  ;;  %1492 = vadd.xlane.f32.xlu1 %v1389_v26  ;;  %v3685_v14 = vmul.f32 -1.442695, %v435_v53  ;;  %v3695_v26 = vsub.s32 %v1789_v0, %v2997_v54 }
 0x1b1   :  { %v2656_v5 = vpop.eup %2655  ;;  %2681 = vrcp.f32 %v1105_v15  ;;  %v3698_v15 = vsub.s32 %v1782_v32, %v2997_v54 }
 0x1b2   :  { %v2658_v2 = vpop.eup %2657  ;;  %2683 = vpow2.f32 %v2248_v62  ;;  %v1303_v49 = vmul.f32 %v2656_v5, %v3579_v28  ;;  %v675_v62 = vadd.f32 %v674_v31, %v3006_v59  ;;  %v3700_v31 = vpop.f32.mrf.mxu1 }
 0x1b3   :  { %v2660_v27 = vpop.eup %2659  ;;  %2685 = vpow2.f32 %v2288_v7  ;;  %v1343_v56 = vmul.f32 %v2658_v2, %v3583_v46  ;;  %v1447_v28 = vpop.xlane.xlu0 %1446  ;;  %v3669_v46 = vadd.f32 %v3539_v43, %v3004_v58 }
 0x1b4   :  { %v2662_v37 = vpop.eup %2661  ;;  %v1066_v57 = vadd.f32 1.0, %v2660_v27  ;;  %2687 = vtanh.f32 %v415_v24  ;;  %v1390_v40 = vmul.f32 %v3506_v47, %v1303_v49  ;;  %v3683_v43 = vpop.f32.mrf.mxu0  ;;  %v441_v49 = vadd.f32 %v3617_v36, %v3006_v59 }
 0x1b5   :  { %v3661_v25 = vpop.eup %2663  ;;  %v1106_v41 = vadd.f32 1.0, %v2662_v37  ;;  %2689 = vtanh.f32 %v655_v29  ;;  %v1430_v19 = vmul.f32 %v3506_v47, %v1343_v56  ;;  %v1796_v29 = vadd.s32 4294967272, %v3643_v44 }
 0x1b6   :  { %v3665_v35 = vpop.eup %2665  ;;  %2691 = vrcp.f32 %v1066_v57  ;;  %1494 = vadd.xlane.f32.xlu0 %v1390_v40  ;;  %v681_v27 = vadd.f32 %v680_v38, %v3006_v59  ;;  %v686_v40 = vpop.f32.mrf.mxu1 }
 0x1b7   :  { %v2668_v22 = vpop.eup %2667  ;;  %2693 = vrcp.f32 %v1106_v41  ;;  %1574 = vadd.xlane.f32.xlu1 %v1430_v19  ;;  %v3691_v33 = vpop.xlane.xlu0 %1526  ;;  %v3719_v36 = vsub.s32 %v1796_v29, %v2997_v54 }
 0x1b8   :  { %v2670_v13 = vpop.eup %2669  ;;  %2695 = vpow2.f32 %v2249_v61  ;;  %v1304_v18 = vmul.f32 %v2668_v22, %v3603_v11  ;;  %v3689_v12 = vpop.xlane.xlu1 %1528 }
 0x1b9   :  { %v2672_v20 = vpop.eup %2671  ;;  %2697 = vpow2.f32 %v2289_v55  ;;  %v1344_v6 = vmul.f32 %v2670_v13, %v3607_v21  ;;  %v3706_v21 = vpop.f32.mrf.mxu0  ;;  %v1616_v55 = vadd.f32 %v3650_v9, %v1447_v28 }
 0x1ba   :  { %v2674_v7 = vpop.eup %2673  ;;  %v1067_v24 = vadd.f32 1.0, %v2672_v20  ;;  %2699 = vtanh.f32 %v421_v8  ;;  %v1391_v11 = vmul.f32 %v3506_v47, %v1304_v18  ;;  %v2291_v8 = vmul.f32 -1.442695, %v675_v62 }
 0x1bb   :  { %v3704_v5 = vpop.eup %2675  ;;  %v1107_v61 = vadd.f32 1.0, %v2674_v7  ;;  %2701 = vtanh.f32 %v661_v23  ;;  %v1431_v2 = vmul.f32 %v3506_v47, %v1344_v6  ;;  %v1449_v53 = vpop.xlane.xlu0 %1448  ;;  %v1781_v19 = vrot.slane %v1616_v55, %v3677_v16 }
 0x1bc   :  { %v3710_v10 = vpop.eup %2677  ;;  %2703 = vrcp.f32 %v1067_v24  ;;  %1496 = vadd.xlane.f32.xlu1 %v1391_v11  ;;  %v1451_v52 = vpop.xlane.xlu1 %1450  ;;  %v1617_v37 = vadd.f32 %v3650_v9, %v1449_v53  ;;  %v1803_v7 = vadd.s32 4294967264, %v3643_v44 }
 0x1bd   :  { %v2680_v56 = vpop.eup %2679  ;;  %2705 = vrcp.f32 %v1107_v61  ;;  %1576 = vadd.xlane.f32.xlu0 %v1431_v2  ;;  %v1618_v23 = vadd.f32 %v3650_v9, %v1451_v52  ;;  %v3721_v41 = vpop.f32.mrf.mxu0  ;;  %v2292_v2 = vmul.f32 -1.442695, %v681_v27 }
 0x1be   :  { %v2682_v57 = vpop.eup %2681  ;;  %2707 = vpow2.f32 %v2250_v48  ;;  %v1305_v28 = vmul.f32 %v2680_v56, %v3628_v17  ;;  %v1786_v38 = vrot.slane %v1617_v37, %v3698_v15  ;;  %v3740_v11 = vpop.f32.mrf.mxu1  ;;  %v447_v37 = vadd.f32 %v3657_v4, %v3006_v59 }
 0x1bf   :  { %v2684_v0 = vpop.eup %2683  ;;  %2709 = vpow2.f32 %v2290_v60  ;;  %v1793_v32 = vrot.slane %v1618_v23, %v3695_v26  ;;  %v1345_v48 = vmul.f32 %v2682_v57, %v3632_v30  ;;  %v3729_v18 = vpop.xlane.xlu0 %1530  ;;  %v3754_v27 = vsub.s32 %v1803_v7, %v2997_v54 }
 0x1c0   :  { %v2686_v22 = vpop.eup %2685  ;;  %v1068_v13 = vadd.f32 1.0, %v2684_v0  ;;  %2711 = vtanh.f32 %v3669_v46  ;;  %v1392_v17 = vmul.f32 %v3506_v47, %v1305_v28  ;;  %v1453_v62 = vpop.xlane.xlu1 %1452  ;;  %v1788_v6 = vsel %vm1787_vm0, %v1786_v38, %v1781_v19 }
 0x1c1   :  { %v3731_v60 = vpop.eup %2687  ;;  %v1108_v20 = vadd.f32 1.0, %v2686_v22  ;;  %2713 = vtanh.f32 %v3673_v3  ;;  %v673_v46 = vadd.f32 %v3611_v39, %v3004_v58  ;;  %v1619_v30 = vadd.f32 %v3650_v9, %v1453_v62  ;;  %v3745_v52 = vpop.f32.mrf.mxu0 }
 0x1c2   :  { %v3736_v24 = vpop.eup %2689  ;;  %2715 = vrcp.f32 %v1068_v13  ;;  %1498 = vadd.xlane.f32.xlu0 %v1392_v17  ;;  %v1795_v29 = vsel %vm1794_vm1, %v1793_v32, %v1788_v6  ;;  %v2252_v3 = vmul.f32 -1.442695, %v441_v49  ;;  %v1432_v39 = vmul.f32 %v3506_v47, %v1345_v48  ;;  %v692_v28 = vpop.f32.mrf.mxu1 }
 0x1c3   :  { %v2692_v61 = vpop.eup %2691  ;;  %2717 = vrcp.f32 %v1108_v20  ;;  %v1800_v56 = vrot.slane %v1619_v30, %v3719_v36  ;;  %v687_v4 = vadd.f32 %v686_v40, %v3006_v59  ;;  %v1810_v38 = vadd.s32 4294967256, %v3643_v44 }
 0x1c4   :  { %v2694_v55 = vpop.eup %2693  ;;  %2719 = vpow2.f32 %v3685_v14  ;;  %v1306_v53 = vmul.f32 %v2692_v61, %v3661_v25  ;;  %v439_v62 = vadd.f32 %v3597_v1, %v3004_v58  ;;  %v2253_v20 = vmul.f32 -1.442695, %v447_v37  ;;  %v3773_v6 = vpop.f32.mrf.mxu1 }
 0x1c5   :  { %v2696_v23 = vpop.eup %2695  ;;  %2721 = vpow2.f32 %v2291_v8  ;;  %v1346_v49 = vmul.f32 %v2694_v55, %v3665_v35  ;;  %v1802_v0 = vsel %vm1801_vm2, %v1800_v56, %v1795_v29  ;;  %v1455_v19 = vpop.xlane.xlu0 %1454  ;;  %v2293_v29 = vmul.f32 -1.442695, %v687_v4 }
 0x1c6   :  { %v2698_v57 = vpop.eup %2697  ;;  %v1069_v14 = vadd.f32 1.0, %v2696_v23  ;;  %2723 = vtanh.f32 %v3681_v45  ;;  %v1393_v25 = vmul.f32 %v3506_v47, %v1306_v53  ;;  %1578 = vadd.xlane.f32.xlu0 %v1432_v39  ;;  %v3762_v35 = vpop.xlane.xlu1 %1532  ;;  %v1620_v17 = vadd.f32 %v3650_v9, %v1455_v19 }
 0x1c7   :  { %v3759_v8 = vpop.eup %2699  ;;  %v1109_v32 = vadd.f32 1.0, %v2698_v57  ;;  %2725 = vtanh.f32 %v673_v46  ;;  %v3767_v45 = vpop.f32.mrf.mxu0  ;;  %v1433_v13 = vmul.f32 %v3506_v47, %v1346_v49  ;;  %v453_v61 = vadd.f32 %v3706_v21, %v3006_v59 }
 0x1c8   :  { %v3765_v22 = vpop.eup %2701  ;;  %2727 = vrcp.f32 %v1069_v14  ;;  %1500 = vadd.xlane.f32.xlu1 %v1393_v25  ;;  %v1807_v46 = vrot.slane %v1620_v17, %v3754_v27  ;;  %v3780_v55 = vsub.s32 %v1810_v38, %v2997_v54  ;;  %v693_v37 = vadd.f32 %v692_v28, %v3006_v59 }
 0x1c9   :  { %v2704_v48 = vpop.eup %2703  ;;  %2729 = vrcp.f32 %v1109_v32  ;;  %v3790_v49 = vpop.xlane.xlu0 %1534  ;;  %v1817_v57 = vadd.s32 4294967248, %v3643_v44  ;;  %v679_v25 = vadd.f32 %v3647_v42, %v3004_v58  ;;  %v445_v28 = vadd.f32 %v3630_v50, %v3004_v58 }
 0x1ca   :  { %v2706_v40 = vpop.eup %2705  ;;  %2731 = vpow2.f32 %v2252_v3  ;;  %1580 = vadd.xlane.f32.xlu0 %v1433_v13  ;;  %v1307_v7 = vmul.f32 %v2704_v48, %v3704_v5  ;;  %v3782_v3 = vpop.f32.mrf.mxu0  ;;  %v1809_v5 = vsel %vm1808_vm3, %v1807_v46, %v1802_v0  ;;  %v2254_v32 = vmul.f32 -1.442695, %v453_v61 }
 0x1cb   :  { %v2708_v30 = vpop.eup %2707  ;;  %2733 = vpow2.f32 %v2292_v2  ;;  %v1347_v56 = vmul.f32 %v2706_v40, %v3710_v10  ;;  %v698_v10 = vpop.f32.mrf.mxu1  ;;  %v2294_v40 = vmul.f32 -1.442695, %v693_v37  ;;  %v3809_v50 = vsub.s32 %v1817_v57, %v2997_v54 }
 0x1cc   :  { %v2710_v1 = vpop.eup %2709  ;;  %v1070_v53 = vadd.f32 1.0, %v2708_v30  ;;  %v1394_v39 = vmul.f32 %v3506_v47, %v1307_v7  ;;  %2735 = vtanh.f32 %v439_v62  ;;  %v3800_v38 = vpop.f32.mrf.mxu0 }
 0x1cd   :  { %v3787_v23 = vpop.eup %2711  ;;  %v1110_v2 = vadd.f32 1.0, %v2710_v1  ;;  %v1457_v21 = vpop.xlane.xlu1 %1456  ;;  %v1434_v42 = vmul.f32 %v3506_v47, %v1347_v56 }
 0x1ce   :  { %v3793_v14 = vpop.eup %2713  ;;  %2737 = vrcp.f32 %v1070_v53  ;;  %1502 = vadd.xlane.f32.xlu0 %v1394_v39  ;;  %v1621_v0 = vadd.f32 %v3650_v9, %v1457_v21  ;;  %v3802_v13 = vpop.f32.mrf.mxu1  ;;  %v1824_v39 = vadd.s32 4294967240, %v3643_v44 }
 0x1cf   :  { %v2716_v19 = vpop.eup %2715  ;;  %2739 = vrcp.f32 %v1110_v2  ;;  %v470_v2 = vpop.f32.mrf.mxu0 }
 0x1d0   :  { %v2718_v4 = vpop.eup %2717  ;;  %2741 = vpow2.f32 %v2253_v20  ;;  %v1308_v17 = vmul.f32 %v2716_v19, %v3731_v60  ;;  %v1814_v48 = vrot.slane %v1621_v0, %v3780_v55  ;;  %v3822_v37 = vpop.f32.mrf.mxu1 }
 0x1d1   :  { %v2720_v62 = vpop.eup %2719  ;;  %2743 = vpow2.f32 %v2293_v29  ;;  %v1348_v7 = vmul.f32 %v2718_v4, %v3736_v24  ;;  %v459_v29 = vadd.f32 %v3745_v52, %v3006_v59  ;;  %v3817_v53 = vpop.xlane.xlu1 %1536  ;;  %v685_v52 = vadd.f32 %v3700_v31, %v3004_v58 }
 0x1d2   :  { %v2722_v46 = vpop.eup %2721  ;;  %v1071_v20 = vadd.f32 1.0, %v2720_v62  ;;  %2745 = vtanh.f32 %v679_v25  ;;  %v1395_v30 = vmul.f32 %v3506_v47, %v1308_v17  ;;  %1582 = vadd.xlane.f32.xlu0 %v1434_v42  ;;  %v1816_v60 = vsel %vm1815_vm4, %v1814_v48, %v1809_v5 }
 0x1d3   :  { %v3813_v61 = vpop.eup %2723  ;;  %v1111_v1 = vadd.f32 1.0, %v2722_v46  ;;  %2747 = vtanh.f32 %v445_v28  ;;  %v1459_v24 = vpop.xlane.xlu0 %1458  ;;  %v1435_v5 = vmul.f32 %v3506_v47, %v1348_v7  ;;  %v699_v25 = vadd.f32 %v698_v10, %v3006_v59 }
 0x1d4   :  { %v3820_v56 = vpop.eup %2725  ;;  %2749 = vrcp.f32 %v1071_v20  ;;  %1504 = vadd.xlane.f32.xlu1 %v1395_v30  ;;  %v1622_v21 = vadd.f32 %v3650_v9, %v1459_v24  ;;  %v2255_v17 = vmul.f32 -1.442695, %v459_v29  ;;  %v465_v42 = vadd.f32 %v3782_v3, %v3006_v59  ;;  %v3836_v10 = vpop.f32.mrf.mxu0 }
 0x1d5   :  { %v2728_v57 = vpop.eup %2727  ;;  %2751 = vrcp.f32 %v1111_v1  ;;  %v3834_v48 = vsub.s32 %v1824_v39, %v2997_v54  ;;  %v3838_v7 = vpop.f32.mrf.mxu1  ;;  %v2295_v20 = vmul.f32 -1.442695, %v699_v25  ;;  %v1838_v3 = vadd.s32 4294967224, %v3643_v44 }
 0x1d6   :  { %v2730_v0 = vpop.eup %2729  ;;  %2753 = vpow2.f32 %v2254_v32  ;;  %1584 = vadd.xlane.f32.xlu0 %v1435_v5  ;;  %v1309_v19 = vmul.f32 %v2728_v57, %v3759_v8  ;;  %v1821_v28 = vrot.slane %v1622_v21, %v3809_v50  ;;  %v451_v24 = vadd.f32 %v3683_v43, %v3004_v58 }
 0x1d7   :  { %v2732_v4 = vpop.eup %2731  ;;  %2755 = vpow2.f32 %v2294_v40  ;;  %v1349_v8 = vmul.f32 %v2730_v0, %v3765_v22  ;;  %v3844_v1 = vpop.xlane.xlu0 %1538  ;;  %v1831_v39 = vadd.s32 4294967232, %v3643_v44  ;;  %v2256_v5 = vmul.f32 -1.442695, %v465_v42 }
 0x1d8   :  { %v2734_v31 = vpop.eup %2733  ;;  %v1072_v62 = vadd.f32 1.0, %v2732_v4  ;;  %v1396_v32 = vmul.f32 %v3506_v47, %v1309_v19  ;;  %v1823_v46 = vsel %vm1822_vm5, %v1821_v28, %v1816_v60  ;;  %2757 = vtanh.f32 %v685_v52  ;;  %v476_v52 = vpop.f32.mrf.mxu0 }
 0x1d9   :  { %v1112_v40 = vadd.f32 1.0, %v2734_v31  ;;  %v1461_v30 = vpop.xlane.xlu1 %1460  ;;  %v3846_v29 = vpop.eup %2735  ;;  %v471_v21 = vadd.f32 %v470_v2, %v3006_v59  ;;  %v1436_v19 = vmul.f32 %v3506_v47, %v1349_v8  ;;  %v691_v4 = vadd.f32 %v3740_v11, %v3004_v58 }
 0x1da   :  { %2759 = vrcp.f32 %v1072_v62  ;;  %1506 = vadd.xlane.f32.xlu0 %v1396_v32  ;;  %v1623_v22 = vadd.f32 %v3650_v9, %v1461_v30  ;;  %v710_v25 = vpop.f32.mrf.mxu1  ;;  %v3860_v2 = vsub.s32 %v1838_v3, %v2997_v54  ;;  %v477_v11 = vadd.f32 %v476_v52, %v3006_v59 }
 0x1db   :  { %v2738_v60 = vpop.eup %2737  ;;  %2761 = vrcp.f32 %v1112_v40  ;;  %v2257_v40 = vmul.f32 -1.442695, %v471_v21 }
 0x1dc   :  { %v2740_v57 = vpop.eup %2739  ;;  %2763 = vpow2.f32 %v2255_v17  ;;  %v1310_v0 = vmul.f32 %v2738_v60, %v3787_v23  ;;  %v1828_v43 = vrot.slane %v1623_v22, %v3834_v48  ;;  %v457_v60 = vadd.f32 %v3721_v41, %v3004_v58 }
 0x1dd   :  { %v2742_v28 = vpop.eup %2741  ;;  %2765 = vpow2.f32 %v2295_v20  ;;  %v1350_v42 = vmul.f32 %v2740_v57, %v3793_v14  ;;  %v3867_v14 = vpop.f32.mrf.mxu1  ;;  %v697_v57 = vadd.f32 %v3773_v6, %v3004_v58  ;;  %v2258_v41 = vmul.f32 -1.442695, %v477_v11 }
 0x1de   :  { %v2744_v31 = vpop.eup %2743  ;;  %v1073_v17 = vadd.f32 1.0, %v2742_v28  ;;  %2767 = vtanh.f32 %v451_v24  ;;  %v1397_v62 = vmul.f32 %v3506_v47, %v1310_v0  ;;  %1586 = vadd.xlane.f32.xlu0 %v1436_v19  ;;  %v1830_v23 = vsel %vm1829_vm6, %v1828_v43, %v1823_v46 }
 0x1df   :  { %v2746_v32 = vpop.eup %2745  ;;  %v1113_v8 = vadd.f32 1.0, %v2744_v31  ;;  %2769 = vpow2.f32 %v2256_v5  ;;  %v1463_v20 = vpop.xlane.xlu0 %1462  ;;  %v1437_v3 = vmul.f32 %v3506_v47, %v1350_v42  ;;  %v3871_v24 = vsub.s32 %v1831_v39, %v2997_v54 }
 0x1e0   :  { %v3865_v30 = vpop.eup %2747  ;;  %2771 = vrcp.f32 %v1073_v17  ;;  %1508 = vadd.xlane.f32.xlu1 %v1397_v62  ;;  %v1624_v46 = vadd.f32 %v3650_v9, %v1463_v20  ;;  %v705_v5 = vadd.f32 %v3822_v37, %v3006_v59  ;;  %v463_v19 = vadd.f32 %v3767_v45, %v3004_v58  ;;  %v716_v42 = vpop.f32.mrf.mxu1 }
 0x1e1   :  { %v2750_v22 = vpop.eup %2749  ;;  %2773 = vrcp.f32 %v1113_v8  ;;  %v711_v43 = vadd.f32 %v710_v25, %v3006_v59  ;;  %v1845_v62 = vadd.s32 4294967216, %v3643_v44  ;;  %v469_v25 = vadd.f32 %v3800_v38, %v3004_v58 }
 0x1e2   :  { %v2752_v21 = vpop.eup %2751  ;;  %2775 = vtanh.f32 %v691_v4  ;;  %1588 = vadd.xlane.f32.xlu0 %v1437_v3  ;;  %v1311_v39 = vmul.f32 %v2750_v22, %v3813_v61  ;;  %v1835_v52 = vrot.slane %v1624_v46, %v3871_v24  ;;  %v2296_v17 = vmul.f32 -1.442695, %v705_v5 }
 0x1e3   :  { %v2754_v0 = vpop.eup %2753  ;;  %2777 = vpow2.f32 %v2257_v40  ;;  %v1351_v6 = vmul.f32 %v2752_v21, %v3820_v56  ;;  %v1543_v45 = vpop.xlane.xlu0 %1542  ;;  %v3892_v11 = vadd.s32 4294967208, %v3643_v44  ;;  %v717_v3 = vadd.f32 %v716_v42, %v3006_v59 }
 0x1e4   :  { %v2756_v37 = vpop.eup %2755  ;;  %v1074_v28 = vadd.f32 1.0, %v2754_v0  ;;  %v1398_v4 = vmul.f32 %v3506_v47, %v1311_v39  ;;  %v1837_v31 = vsel %vm1836_vm7, %v1835_v52, %v1830_v23  ;;  %2779 = vtanh.f32 %v457_v60 }
 0x1e5   :  { %v1114_v61 = vadd.f32 1.0, %v2756_v37  ;;  %v1465_v8 = vpop.xlane.xlu1 %1464  ;;  %v2758_v40 = vpop.eup %2757  ;;  %v2297_v23 = vmul.f32 -1.442695, %v711_v43  ;;  %v1438_v60 = vmul.f32 %v3506_v47, %v1351_v6  ;;  %v3900_v21 = vsub.s32 %v1845_v62, %v2997_v54 }
 0x1e6   :  { %2781 = vrcp.f32 %v1074_v28  ;;  %1510 = vadd.xlane.f32.xlu0 %v1398_v4  ;;  %v1625_v56 = vadd.f32 %v3650_v9, %v1465_v8  ;;  %v1664_v52 = vadd.f32 %v3650_v9, %v1543_v45  ;;  %v2298_v42 = vmul.f32 -1.442695, %v717_v3 }
 0x1e7   :  { %v2760_v20 = vpop.eup %2759  ;;  %2783 = vrcp.f32 %v1114_v61 }
 0x1e8   :  { %v2762_v46 = vpop.eup %2761  ;;  %2785 = vpow2.f32 %v2258_v41  ;;  %v1312_v22 = vmul.f32 %v2760_v20, %v3846_v29  ;;  %v1842_v38 = vrot.slane %v1625_v56, %v3860_v2  ;;  %v2048_v62 = vrot.slane %v1664_v52, %v3677_v16 }
 0x1e9   :  { %v2764_v5 = vpop.eup %2763  ;;  %2787 = vpow2.f32 %v2296_v17  ;;  %v1352_v39 = vmul.f32 %v2762_v46, %v2746_v32  ;;  %v1545_v0 = vpop.xlane.xlu1 %1544  ;;  %v3909_v32 = vld [vmem:[%s4197_s3] ss:$0 sm:$0xff]  ;;  %v475_v56 = vadd.f32 %v3836_v10, %v3004_v58 }
 0x1ea   :  { %v2766_v43 = vpop.eup %2765  ;;  %2789 = vtanh.f32 %v697_v57  ;;  %v1075_v59 = vadd.f32 1.0, %v2764_v5  ;;  %v1399_v41 = vmul.f32 %v3506_v47, %v1312_v22  ;;  %1590 = vadd.xlane.f32.xlu0 %v1438_v60  ;;  %v1844_v29 = vsel %vm1843_vm8, %v1842_v38, %v1837_v31 }
 0x1eb   :  { %v2768_v37 = vpop.eup %2767  ;;  %v1115_v28 = vadd.f32 1.0, %v2766_v43  ;;  %2791 = vpow2.f32 %v2297_v23  ;;  %v1665_v4 = vadd.f32 %v3650_v9, %v1545_v0  ;;  %v1467_v6 = vpop.xlane.xlu0 %1466  ;;  %v1439_v47 = vmul.f32 %v3909_v32, %v1352_v39 }
 0x1ec   :  { %v2770_v61 = vpop.eup %2769  ;;  %2793 = vrcp.f32 %v1075_v59  ;;  %1512 = vadd.xlane.f32.xlu1 %v1399_v41  ;;  %v1626_v57 = vadd.f32 %v3650_v9, %v1467_v6 }
 0x1ed   :  { %v2772_v31 = vpop.eup %2771  ;;  %2795 = vrcp.f32 %v1115_v28  ;;  %v1076_v17 = vadd.f32 1.0, %v2770_v61  ;;  %v2052_v8 = vrot.slane %v1665_v4, %v3698_v15 }
 0x1ee   :  { %v2774_v45 = vpop.eup %2773  ;;  %2797 = vtanh.f32 %v463_v19  ;;  %1592 = vadd.xlane.f32.xlu0 %v1439_v47  ;;  %v1313_v20 = vmul.f32 %v2772_v31, %v3865_v30  ;;  %v1849_v23 = vrot.slane %v1626_v57, %v3900_v21  ;;  %v703_v30 = vadd.f32 %v3802_v13, %v3004_v58 }
 0x1ef   :  { %v2776_v3 = vpop.eup %2775  ;;  %2799 = vrcp.f32 %v1076_v17  ;;  %v1353_v46 = vmul.f32 %v2774_v45, %v2758_v40  ;;  %v2053_v22 = vsel %vm1787_vm0, %v2052_v8, %v2048_v62  ;;  %v1547_v60 = vpop.xlane.xlu0 %1546  ;;  %v3927_v40 = vsub.s32 %v3892_v11, %v2997_v54 }
 0x1f0   :  { %v2778_v38 = vpop.eup %2777  ;;  %2801 = vpow2.f32 %v2298_v42  ;;  %v1400_v5 = vmul.f32 %v3909_v32, %v1313_v20  ;;  %v1851_v19 = vsel %vm1850_vm9, %v1849_v23, %v1844_v29  ;;  %v1666_v39 = vadd.f32 %v3650_v9, %v1547_v60 }
 0x1f1   :  { %2803 = vtanh.f32 %v469_v25  ;;  %v1077_v10 = vadd.f32 1.0, %v2778_v38  ;;  %v1469_v52 = vpop.xlane.xlu1 %1468  ;;  %v2780_v0 = vpop.eup %2779  ;;  %v709_v25 = vadd.f32 %v3838_v7, %v3004_v58  ;;  %v1859_v29 = vadd.s32 4294967200, %v3643_v44 }
 0x1f2   :  { %2805 = vtanh.f32 %v475_v56  ;;  %1514 = vadd.xlane.f32.xlu0 %v1400_v5  ;;  %v1627_v43 = vadd.f32 %v3650_v9, %v1469_v52  ;;  %v2057_v59 = vrot.slane %v1666_v39, %v3695_v26  ;;  %v1440_v42 = vmul.f32 %v3909_v32, %v1353_v46 }
 0x1f3   :  { %v2782_v41 = vpop.eup %2781  ;;  %2807 = vrcp.f32 %v1077_v10  ;;  %v3941_v45 = vsub.s32 %v1859_v29, %v2997_v54  ;;  %v1866_v38 = vadd.s32 4294967192, %v3643_v44 }
 0x1f4   :  { %v2784_v13 = vpop.eup %2783  ;;  %v1314_v28 = vmul.f32 %v2782_v41, %v2768_v37  ;;  %v1856_v11 = vrot.slane %v1627_v43, %v3927_v40  ;;  %v2058_v4 = vsel %vm1794_vm1, %v2057_v59, %v2053_v22  ;;  %2809 = vtanh.f32 %v703_v30 }
 0x1f5   :  { %v2786_v6 = vpop.eup %2785  ;;  %v1354_v61 = vmul.f32 %v2784_v13, %v2776_v3  ;;  %v1549_v47 = vpop.xlane.xlu1 %1548  ;;  %2811 = vtanh.f32 %v709_v25  ;;  %v715_v59 = vadd.f32 %v3867_v14, %v3004_v58 }
 0x1f6   :  { %v2788_v57 = vpop.eup %2787  ;;  %v1078_v31 = vadd.f32 1.0, %v2786_v6  ;;  %v1401_v17 = vmul.f32 %v3909_v32, %v1314_v28  ;;  %1594 = vadd.xlane.f32.xlu0 %v1440_v42  ;;  %v1858_v7 = vsel %vm1857_vm10, %v1856_v11, %v1851_v19  ;;  %v1667_v62 = vadd.f32 %v3650_v9, %v1549_v47 }
 0x1f7   :  { %v2790_v37 = vpop.eup %2789  ;;  %v1116_v8 = vadd.f32 1.0, %v2788_v57  ;;  %v1471_v56 = vpop.xlane.xlu0 %1470  ;;  %v1441_v23 = vmul.f32 %v3909_v32, %v1354_v61  ;;  %v3957_v47 = vsub.s32 %v1866_v38, %v2997_v54 }
 0x1f8   :  { %v2792_v20 = vpop.eup %2791  ;;  %2813 = vrcp.f32 %v1078_v31  ;;  %1516 = vadd.xlane.f32.xlu1 %v1401_v17  ;;  %v2062_v3 = vrot.slane %v1667_v62, %v3719_v36  ;;  %v1628_v46 = vadd.f32 %v3650_v9, %v1471_v56 }
 0x1f9   :  { %v2794_v22 = vpop.eup %2793  ;;  %2815 = vrcp.f32 %v1116_v8  ;;  %v1117_v60 = vadd.f32 1.0, %v2792_v20  ;;  %v1551_v5 = vpop.xlane.xlu1 %1550 }
 0x1fa   :  { %v2796_v19 = vpop.eup %2795  ;;  %1596 = vadd.xlane.f32.xlu0 %v1441_v23  ;;  %v1315_v39 = vmul.f32 %v2794_v22, %v2780_v0  ;;  %v2063_v10 = vsel %vm1801_vm2, %v2062_v3, %v2058_v4  ;;  %v1863_v30 = vrot.slane %v1628_v46, %v3941_v45  ;;  %v1668_v52 = vadd.f32 %v3650_v9, %v1551_v5 }
 0x1fb   :  { %v2798_v43 = vpop.eup %2797  ;;  %2817 = vrcp.f32 %v1117_v60  ;;  %v1355_v41 = vmul.f32 %v2796_v19, %v2790_v37  ;;  %v1880_v19 = vadd.s32 4294967176, %v3643_v44 }
 0x1fc   :  { %v2800_v25 = vpop.eup %2799  ;;  %v1402_v29 = vmul.f32 %v3909_v32, %v1315_v39  ;;  %v1865_v13 = vsel %vm1864_vm11, %v1863_v30, %v1858_v7  ;;  %v2067_v28 = vrot.slane %v1668_v52, %v3754_v27  ;;  %2819 = vtanh.f32 %v715_v59 }
 0x1fd   :  { %v2802_v0 = vpop.eup %2801  ;;  %v1442_v42 = vmul.f32 %v3909_v32, %v1355_v41  ;;  %v1316_v11 = vmul.f32 %v2800_v25, %v2798_v43  ;;  %v1473_v4 = vpop.xlane.xlu1 %1472  ;;  %v1873_v7 = vadd.s32 4294967184, %v3643_v44  ;;  %v1413_v25 = vmul.f32 %v3909_v32, %v3248_v34 }
 0x1fe   :  { %v2804_v6 = vpop.eup %2803  ;;  %v1118_v61 = vadd.f32 1.0, %v2802_v0  ;;  %1518 = vadd.xlane.f32.xlu0 %v1402_v29  ;;  %v2068_v58 = vsel %vm1808_vm3, %v2067_v28, %v2063_v10  ;;  %v1629_v14 = vadd.f32 %v3650_v9, %v1473_v4 }
 0x1ff   :  { %v2806_v57 = vpop.eup %2805  ;;  %1598 = vadd.xlane.f32.xlu1 %v1442_v42  ;;  %v1403_v31 = vmul.f32 %v3909_v32, %v1316_v11  ;;  %v3968_v60 = vsub.s32 %v1873_v7, %v2997_v54  ;;  %v3982_v42 = vsub.s32 %v1880_v19, %v2997_v54 }
 0x200   :  { %v2808_v17 = vpop.eup %2807  ;;  %2821 = vrcp.f32 %v1118_v61  ;;  %v1870_v62 = vrot.slane %v1629_v14, %v3957_v47 }
 0x201   :  { %v1317_v37 = vmul.f32 %v2808_v17, %v2804_v6  ;;  %v1553_v8 = vpop.xlane.xlu1 %1552  ;;  %v2810_v56 = vpop.eup %2809 }
 0x202   :  { %v1872_v20 = vsel %vm1871_vm12, %v1870_v62, %v1865_v13  ;;  %v1669_v23 = vadd.f32 %v3650_v9, %v1553_v8  ;;  %v2812_v22 = vpop.eup %2811 }
 0x203   :  { %1520 = vadd.xlane.f32.xlu1 %v1403_v31  ;;  %v1404_v3 = vmul.f32 %v3909_v32, %v1317_v37  ;;  %v1475_v46 = vpop.xlane.xlu0 %1474  ;;  %v1428_v31 = vmul.f32 %v3909_v32, %v3600_v63 }
 0x204   :  { %v1630_v38 = vadd.f32 %v3650_v9, %v1475_v46  ;;  %v2072_v5 = vrot.slane %v1669_v23, %v3780_v55 }
 0x205   :  { %v2814_v39 = vpop.eup %2813  ;;  %1522 = vadd.xlane.f32.xlu0 %v1404_v3  ;;  %v1555_v10 = vpop.xlane.xlu1 %1554 }
 0x206   :  { %v2816_v30 = vpop.eup %2815  ;;  %v1318_v52 = vmul.f32 %v2814_v39, %v2806_v57  ;;  %v1877_v43 = vrot.slane %v1630_v38, %v3968_v60  ;;  %v2073_v59 = vsel %vm1815_vm4, %v2072_v5, %v2068_v58  ;;  %v1670_v41 = vadd.f32 %v3650_v9, %v1555_v10 }
 0x207   :  { %v1356_v29 = vmul.f32 %v2816_v30, %v2810_v56 }
 0x208   :  { %v2818_v13 = vpop.eup %2817  ;;  %v1405_v28 = vmul.f32 %v3909_v32, %v1318_v52  ;;  %v1879_v44 = vsel %vm1878_vm13, %v1877_v43, %v1872_v20  ;;  %v2077_v0 = vrot.slane %v1670_v41, %v3809_v50  ;;  %v1429_v20 = vmul.f32 %v3909_v32, %v3623_v51 }
 0x209   :  { %1540 = vadd.xlane.f32.xlu0 %v1413_v25  ;;  %v1477_v11 = vpop.xlane.xlu1 %1476  ;;  %v1443_v34 = vmul.f32 %v3909_v32, %v1356_v29  ;;  %v1357_v58 = vmul.f32 %v2818_v13, %v2812_v22  ;;  %v2820_v57 = vpop.eup %2819 }
 0x20a   :  { %1524 = vadd.xlane.f32.xlu1 %v1405_v28  ;;  %v1557_v4 = vpop.xlane.xlu0 %1556  ;;  %v2078_v6 = vsel %vm1822_vm5, %v2077_v0, %v2073_v59  ;;  %v1631_v61 = vadd.f32 %v3650_v9, %v1477_v11 }
 0x20b   :  { %v1671_v14 = vadd.f32 %v3650_v9, %v1557_v4  ;;  %v1444_v37 = vmul.f32 %v3909_v32, %v1357_v58 }
 0x20c   :  { %v1884_v54 = vrot.slane %v1631_v61, %v3982_v42 }
 0x20d   :  { %v2822_v17 = vpop.eup %2821  ;;  %1600 = vadd.xlane.f32.xlu0 %v1443_v34  ;;  %v2082_v7 = vrot.slane %v1671_v14, %v3834_v48 }
 0x20e   :  { %1570 = vadd.xlane.f32.xlu1 %v1428_v31  ;;  %v3993_v62 = vsel %vm1885_vm14, %v1884_v54, %v1879_v44  ;;  %v1358_v23 = vmul.f32 %v2822_v17, %v2820_v57 }
 0x20f   :  { %v1479_v8 = vpop.xlane.xlu0 %1478  ;;  %v2083_v56 = vsel %vm1829_vm6, %v2082_v7, %v2078_v6 }
 0x210   :  { %v1445_v3 = vmul.f32 %v3909_v32, %v1358_v23  ;;  %v1632_v19 = vadd.f32 %v3650_v9, %v1479_v8 }
 0x211   :  { %1602 = vadd.xlane.f32.xlu0 %v1444_v37 }
 0x212   :  { %1572 = vadd.xlane.f32.xlu1 %v1429_v20  ;;  %v1890_v52 = vrot.slane %v1632_v19, %v3677_v16 }
 0x213   :  { %v1559_v63 = vpop.xlane.xlu0 %1558 }
 0x214   :  { %v1672_v46 = vadd.f32 %v3650_v9, %v1559_v63 }
 0x215   :  { %v1481_v22 = vpop.xlane.xlu1 %1480 }
 0x216   :  { %1604 = vadd.xlane.f32.xlu1 %v1445_v3  ;;  %v2087_v38 = vrot.slane %v1672_v46, %v3871_v24  ;;  %v1633_v5 = vadd.f32 %v3650_v9, %v1481_v22 }
 0x218   :  { %v2088_v39 = vsel %vm1836_vm7, %v2087_v38, %v2083_v56  ;;  %v1894_v51 = vrot.slane %v1633_v5, %v3698_v15 }
 0x219   :  { %v1561_v10 = vpop.xlane.xlu1 %1560 }
 0x21a   :  { %v1673_v30 = vadd.f32 %v3650_v9, %v1561_v10  ;;  %v1895_v59 = vsel %vm1787_vm0, %v1894_v51, %v1890_v52 }
 0x21b   :  { %v1483_v32 = vpop.xlane.xlu0 %1482 }
 0x21c   :  { %v1634_v43 = vadd.f32 %v3650_v9, %v1483_v32  ;;  %v2092_v41 = vrot.slane %v1673_v30, %v3860_v2 }
 0x21e   :  { %v1899_v25 = vrot.slane %v1634_v43, %v3695_v26  ;;  %v2093_v44 = vsel %vm1843_vm8, %v2092_v41, %v2088_v39 }
 0x21f   :  { %v1563_v29 = vpop.xlane.xlu0 %1562 }
 0x220   :  { %v1900_v13 = vsel %vm1794_vm1, %v1899_v25, %v1895_v59  ;;  %v1674_v28 = vadd.f32 %v3650_v9, %v1563_v29 }
 0x221   :  { %v1485_v0 = vpop.xlane.xlu1 %1484 }
 0x222   :  { %v2097_v11 = vrot.slane %v1674_v28, %v3900_v21  ;;  %v1635_v4 = vadd.f32 %v3650_v9, %v1485_v0 }
 0x223   :  { %v1565_v6 = vpop.xlane.xlu0 %1564 }
 0x224   :  { %v2098_v61 = vsel %vm1850_vm9, %v2097_v11, %v2093_v44  ;;  %v1675_v34 = vadd.f32 %v3650_v9, %v1565_v6  ;;  %v1904_v14 = vrot.slane %v1635_v4, %v3719_v36 }
 0x226   :  { %v2102_v58 = vrot.slane %v1675_v34, %v3927_v40  ;;  %v1905_v7 = vsel %vm1801_vm2, %v1904_v14, %v1900_v13 }
 0x227   :  { %v1487_v57 = vpop.xlane.xlu0 %1486 }
 0x228   :  { %v2103_v31 = vsel %vm1857_vm10, %v2102_v58, %v2098_v61  ;;  %v1636_v54 = vadd.f32 %v3650_v9, %v1487_v57 }
 0x22a   :  { %v1909_v17 = vrot.slane %v1636_v54, %v3754_v27 }
 0x22b   :  { %v1567_v37 = vpop.xlane.xlu0 %1566 }
 0x22c   :  { %v1910_v8 = vsel %vm1808_vm3, %v1909_v17, %v1905_v7  ;;  %v1676_v56 = vadd.f32 %v3650_v9, %v1567_v37 }
 0x22d   :  { %v1489_v20 = vpop.xlane.xlu1 %1488 }
 0x22e   :  { %v2107_v23 = vrot.slane %v1676_v56, %v3941_v45  ;;  %v1637_v63 = vadd.f32 %v3650_v9, %v1489_v20 }
 0x22f   :  { %v1569_v3 = vpop.xlane.xlu0 %1568 }
 0x230   :  { %v2108_v46 = vsel %vm1864_vm11, %v2107_v23, %v2103_v31  ;;  %v1677_v22 = vadd.f32 %v3650_v9, %v1569_v3  ;;  %v1914_v5 = vrot.slane %v1637_v63, %v3780_v55 }
 0x232   :  { %v2112_v38 = vrot.slane %v1677_v22, %v3957_v47  ;;  %v1915_v30 = vsel %vm1815_vm4, %v1914_v5, %v1910_v8 }
 0x233   :  { %v1491_v19 = vpop.xlane.xlu0 %1490 }
 0x234   :  { %v4034_v39 = vsel %vm1871_vm12, %v2112_v38, %v2108_v46  ;;  %v1638_v51 = vadd.f32 %v3650_v9, %v1491_v19 }
 0x236   :  { %v1919_v10 = vrot.slane %v1638_v51, %v3809_v50 }
 0x238   :  { %v1920_v52 = vsel %vm1822_vm5, %v1919_v10, %v1915_v30 }
 0x239   :  { %v1493_v32 = vpop.xlane.xlu1 %1492 }
 0x23a   :  { %v1639_v43 = vadd.f32 %v3650_v9, %v1493_v32 }
 0x23c   :  { %v1924_v29 = vrot.slane %v1639_v43, %v3834_v48 }
 0x23e   :  { %v1925_v28 = vsel %vm1829_vm6, %v1924_v29, %v1920_v52 }
 0x23f   :  { %v1495_v59 = vpop.xlane.xlu0 %1494 }
 0x240   :  { %v1575_v41 = vpop.xlane.xlu1 %1574  ;;  %v1640_v25 = vadd.f32 %v3650_v9, %v1495_v59 }
 0x242   :  { %v1929_v13 = vrot.slane %v1640_v25, %v3871_v24 }
 0x244   :  { %v1930_v44 = vsel %vm1836_vm7, %v1929_v13, %v1925_v28 }
 0x245   :  { %v1497_v0 = vpop.xlane.xlu1 %1496 }
 0x246   :  { %v1577_v11 = vpop.xlane.xlu0 %1576  ;;  %v1641_v4 = vadd.f32 %v3650_v9, %v1497_v0 }
 0x248   :  { %v1934_v6 = vrot.slane %v1641_v4, %v3860_v2 }
 0x24a   :  { %v1935_v14 = vsel %vm1843_vm8, %v1934_v6, %v1930_v44 }
 0x24b   :  { %v1499_v61 = vpop.xlane.xlu0 %1498 }
 0x24c   :  { %v1642_v34 = vadd.f32 %v3650_v9, %v1499_v61 }
 0x24e   :  { %v1939_v58 = vrot.slane %v1642_v34, %v3900_v21 }
 0x24f   :  { %v1579_v57 = vpop.xlane.xlu0 %1578 }
 0x250   :  { %v1940_v31 = vsel %vm1850_vm9, %v1939_v58, %v1935_v14 }
 0x251   :  { %v1501_v7 = vpop.xlane.xlu1 %1500 }
 0x252   :  { %v1643_v8 = vadd.f32 %v3650_v9, %v1501_v7 }
 0x253   :  { %v1581_v54 = vpop.xlane.xlu0 %1580 }
 0x254   :  { %v1944_v63 = vrot.slane %v1643_v8, %v3927_v40  ;;  %v4075_v8 = vadd.f32 %v3650_v9, %v3689_v12  ;;  %v1682_v12 = vadd.f32 %v3650_v9, %v1579_v57 }
 0x256   :  { %v1945_v5 = vsel %vm1857_vm10, %v1944_v63, %v1940_v31 }
 0x257   :  { %v1503_v17 = vpop.xlane.xlu0 %1502 }
 0x258   :  { %v1644_v56 = vadd.f32 %v3650_v9, %v1503_v17 }
 0x25a   :  { %v1949_v3 = vrot.slane %v1644_v56, %v3941_v45 }
 0x25b   :  { %v1583_v37 = vpop.xlane.xlu0 %1582 }
 0x25c   :  { %v1950_v19 = vsel %vm1864_vm11, %v1949_v3, %v1945_v5 }
 0x25d   :  { %v1505_v23 = vpop.xlane.xlu1 %1504 }
 0x25e   :  { %v1645_v22 = vadd.f32 %v3650_v9, %v1505_v23  ;;  %v1681_v23 = vadd.f32 %v3650_v9, %v1577_v11  ;;  %v1683_v11 = vadd.f32 %v3650_v9, %v1581_v54  ;;  %v2136_v54 = vrot.slane %v1682_v12, %v3695_v26 }
 0x25f   :  { %v1585_v20 = vpop.xlane.xlu0 %1584 }
 0x260   :  { %v1954_v30 = vrot.slane %v1645_v22, %v3957_v47 }
 0x262   :  { %v1955_v43 = vsel %vm1871_vm12, %v1954_v30, %v1950_v19  ;;  %v1684_v30 = vadd.f32 %v3650_v9, %v1583_v37 }
 0x263   :  { %v1507_v46 = vpop.xlane.xlu0 %1506 }
 0x264   :  { %v1646_v38 = vadd.f32 %v3650_v9, %v1507_v46  ;;  %v1680_v46 = vadd.f32 %v3650_v9, %v1575_v41  ;;  %v2131_v41 = vrot.slane %v1681_v23, %v3698_v15 }
 0x266   :  { %v1959_v51 = vrot.slane %v1646_v38, %v3968_v60  ;;  %v2127_v57 = vrot.slane %v1680_v46, %v3677_v16 }
 0x267   :  { %v1587_v10 = vpop.xlane.xlu0 %1586 }
 0x268   :  { %v1960_v59 = vsel %vm1878_vm13, %v1959_v51, %v1955_v43  ;;  %v1685_v43 = vadd.f32 %v3650_v9, %v1585_v20 }
 0x269   :  { %v1509_v52 = vpop.xlane.xlu1 %1508 }
 0x26a   :  { %v1647_v32 = vadd.f32 %v3650_v9, %v1509_v52 }
 0x26b   :  { %v1589_v25 = vpop.xlane.xlu0 %1588 }
 0x26c   :  { %v1964_v29 = vrot.slane %v1647_v32, %v3982_v42  ;;  %v1687_v20 = vadd.f32 %v3650_v9, %v1589_v25 }
 0x26e   :  { %v1965_v13 = vsel %vm1885_vm14, %v1964_v29, %v1960_v59 }
 0x26f   :  { %v1511_v28 = vpop.xlane.xlu0 %1510  ;;  %v4068_v44 = vsel %vm2203_vm15, %v1965_v13, %v3993_v62  ;;  %v4079_v62 = vadd.f32 %v3650_v9, %v3691_v33  ;;  %v2013_v33 = vrot.slane %v4075_v8, %v3860_v2  ;;  %v1686_v13 = vadd.f32 %v3650_v9, %v1587_v10 }
 0x270   :  { %v1648_v31 = vadd.f32 %v3650_v9, %v1511_v28 }
 0x271   :  { %v2008_v51 = vrot.slane %v4079_v62, %v3871_v24 }
 0x272   :  { %v1969_v3 = vrot.slane %v1648_v31, %v3677_v16  ;;  %v2141_v16 = vrot.slane %v1683_v11, %v3719_v36  ;;  %v1660_v11 = vadd.f32 %v3650_v9, %v3790_v49 }
 0x273   :  { %v1591_v0 = vpop.xlane.xlu0 %1590 }
 0x274   :  { %v1688_v10 = vadd.f32 %v3650_v9, %v1591_v0  ;;  %v1659_v0 = vadd.f32 %v3650_v9, %v3762_v35 }
 0x275   :  { %v1513_v61 = vpop.xlane.xlu1 %1512 }
 0x276   :  { %v1649_v7 = vadd.f32 %v3650_v9, %v1513_v61  ;;  %v2166_v12 = vrot.slane %v1688_v10, %v3871_v24 }
 0x277   :  { %v1593_v4 = vpop.xlane.xlu0 %1592 }
 0x278   :  { %v1973_v5 = vrot.slane %v1649_v7, %v3698_v15  ;;  %v1689_v7 = vadd.f32 %v3650_v9, %v1593_v4  ;;  %v2161_v4 = vrot.slane %v1687_v20, %v3834_v48 }
 0x27a   :  { %v1974_v52 = vsel %vm1787_vm0, %v1973_v5, %v1969_v3  ;;  %v2171_v35 = vrot.slane %v1689_v7, %v3860_v2 }
 0x27b   :  { %v1515_v6 = vpop.xlane.xlu0 %1514 }
 0x27c   :  { %v1650_v17 = vadd.f32 %v3650_v9, %v1515_v6  ;;  %v1658_v6 = vadd.f32 %v3650_v9, %v3729_v18 }
 0x27e   :  { %v1978_v22 = vrot.slane %v1650_v17, %v3695_v26  ;;  %v2146_v26 = vrot.slane %v1684_v30, %v3754_v27  ;;  %v2151_v17 = vrot.slane %v1685_v43, %v3780_v55 }
 0x27f   :  { %v1595_v34 = vpop.xlane.xlu0 %1594 }
 0x280   :  { %v1979_v59 = vsel %vm1794_vm1, %v1978_v22, %v1974_v52  ;;  %v2023_v52 = vrot.slane %v1659_v0, %v3927_v40 }
 0x281   :  { %v1517_v58 = vpop.xlane.xlu1 %1516 }
 0x282   :  { %v1651_v19 = vadd.f32 %v3650_v9, %v1517_v58  ;;  %v2132_v58 = vsel %vm1787_vm0, %v2131_v41, %v2127_v57  ;;  %vm2205_vm0 = vcmask 1042434  }
 0x283   :  { %v1597_v14 = vpop.xlane.xlu0 %1596  ;;  %v2137_v25 = vsel %vm1794_vm1, %v2136_v54, %v2132_v58  ;;  %vm2207_vm1 = vcmask 1043459  }
 0x284   :  { %v1983_v28 = vrot.slane %v1651_v19, %v3719_v36  ;;  %v2142_v3 = vsel %vm1801_vm2, %v2141_v16, %v2137_v25  ;;  %v1691_v22 = vadd.f32 %v3650_v9, %v1597_v14 }
 0x286   :  { %v1984_v31 = vsel %vm1801_vm2, %v1983_v28, %v1979_v59  ;;  %v2181_v59 = vrot.slane %v1691_v22, %v3927_v40  ;;  %v2028_v40 = vrot.slane %v1660_v11, %v3941_v45  ;;  %vm2209_vm2 = vcmask 1044484  }
 0x287   :  { %v1519_v56 = vpop.xlane.xlu0 %1518 }
 0x288   :  { %v4082_v63 = vpop.xlane.xlu1 %1598  ;;  %v1652_v38 = vadd.f32 %v3650_v9, %v1519_v56  ;;  %v2156_v56 = vrot.slane %v1686_v13, %v3809_v50 }
 0x289   :  { %v1692_v13 = vadd.f32 %v3650_v9, %v4082_v63 }
 0x28a   :  { %v1988_v29 = vrot.slane %v1652_v38, %v3754_v27  ;;  %v1690_v27 = vadd.f32 %v3650_v9, %v1595_v34  ;;  %v2147_v38 = vsel %vm1808_vm3, %v2146_v26, %v2142_v3  ;;  %v2018_v34 = vrot.slane %v1658_v6, %v3900_v21 }
 0x28b   :  { %v2152_v5 = vsel %vm1815_vm4, %v2151_v17, %v2147_v38  ;;  %v2186_v10 = vrot.slane %v1692_v13, %v3941_v45 }
 0x28c   :  { %v1521_v32 = vpop.xlane.xlu1 %1520  ;;  %v1989_v18 = vsel %vm1808_vm3, %v1988_v29, %v1984_v31  ;;  %v2157_v14 = vsel %vm1822_vm5, %v2156_v56, %v2152_v5  ;;  %v2176_v24 = vrot.slane %v1690_v27, %v3900_v21  ;;  %v1662_v21 = vadd.f32 %v3650_v9, %v3844_v1 }
 0x28d   :  { %v1653_v15 = vadd.f32 %v3650_v9, %v1521_v32  ;;  %v1661_v32 = vadd.f32 %v3650_v9, %v3817_v53  ;;  %v2162_v57 = vsel %vm1829_vm6, %v2161_v4, %v2157_v14 }
 0x28e   :  { %v1523_v37 = vpop.xlane.xlu0 %1522  ;;  %v2167_v29 = vsel %vm1836_vm7, %v2166_v12, %v2162_v57 }
 0x28f   :  { %v1654_v61 = vadd.f32 %v3650_v9, %v1523_v37  ;;  %v1993_v62 = vrot.slane %v1653_v15, %v3780_v55  ;;  %v2172_v53 = vsel %vm1843_vm8, %v2171_v35, %v2167_v29  ;;  %v2033_v1 = vrot.slane %v1661_v32, %v3957_v47 }
 0x290   :  { %v2177_v15 = vsel %vm1850_vm9, %v2176_v24, %v2172_v53 }
 0x291   :  { %v1998_v36 = vrot.slane %v1654_v61, %v3809_v50  ;;  %v1994_v55 = vsel %vm1815_vm4, %v1993_v62, %v1989_v18  ;;  %v2182_v63 = vsel %vm1857_vm10, %v2181_v59, %v2177_v15 }
 0x292   :  { %v1541_v23 = vpop.xlane.xlu0 %1540 }
 0x293   :  { %v1525_v46 = vpop.xlane.xlu1 %1524  ;;  %v1999_v19 = vsel %vm1822_vm5, %v1998_v36, %v1994_v55  ;;  %v1663_v6 = vadd.f32 %v3650_v9, %v1541_v23 }
 0x294   :  { %v1655_v50 = vadd.f32 %v3650_v9, %v1525_v46 }
 0x295   :  { %v2043_v36 = vrot.slane %v1663_v6, %v3982_v42 }
 0x296   :  { %v2003_v41 = vrot.slane %v1655_v50, %v3834_v48  ;;  %v1601_v30 = vpop.xlane.xlu0 %1600 }
 0x297   :  { %v1571_v43 = vpop.xlane.xlu1 %1570  ;;  %v1693_v48 = vadd.f32 %v3650_v9, %v1601_v30 }
 0x298   :  { %v1678_v49 = vadd.f32 %v3650_v9, %v1571_v43  ;;  %v2004_v54 = vsel %vm1829_vm6, %v2003_v41, %v1999_v19 }
 0x299   :  { %v2009_v28 = vsel %vm1836_vm7, %v2008_v51, %v2004_v54  ;;  %v2191_v8 = vrot.slane %v1693_v48, %v3957_v47  ;;  %v2187_v47 = vsel %vm1864_vm11, %v2186_v10, %v2182_v63 }
 0x29a   :  { %v2014_v37 = vsel %vm1843_vm8, %v2013_v33, %v2009_v28  ;;  %v1603_v16 = vpop.xlane.xlu0 %1602  ;;  %v2117_v58 = vrot.slane %v1678_v49, %v3968_v60  ;;  %v2038_v33 = vrot.slane %v1662_v21, %v3968_v60 }
 0x29b   :  { %v1573_v20 = vpop.xlane.xlu1 %1572  ;;  %v2019_v61 = vsel %vm1850_vm9, %v2018_v34, %v2014_v37  ;;  %v1694_v51 = vadd.f32 %v3650_v9, %v1603_v16  ;;  %v2192_v27 = vsel %vm1871_vm12, %v2191_v8, %v2187_v47 }
 0x29c   :  { %v1679_v26 = vadd.f32 %v3650_v9, %v1573_v20  ;;  %v2024_v2 = vsel %vm1857_vm10, %v2023_v52, %v2019_v61  ;;  %v2118_v45 = vsel %vm1878_vm13, %v2117_v58, %v4034_v39 }
 0x29d   :  { %v2029_v31 = vsel %vm1864_vm11, %v2028_v40, %v2024_v2  ;;  %v2196_v17 = vrot.slane %v1694_v51, %v3968_v60 }
 0x29e   :  { %v2122_v7 = vrot.slane %v1679_v26, %v3982_v42  ;;  %v2034_v18 = vsel %vm1871_vm12, %v2033_v1, %v2029_v31 }
 0x29f   :  { %v1605_v25 = vpop.xlane.xlu1 %1604  ;;  %v2039_v56 = vsel %vm1878_vm13, %v2038_v33, %v2034_v18  ;;  %v2197_v3 = vsel %vm1878_vm13, %v2196_v17, %v2192_v27 }
 0x2a0   :  { %v1695_v62 = vadd.f32 %v3650_v9, %v1605_v25  ;;  %v2044_v60 = vsel %vm1885_vm14, %v2043_v36, %v2039_v56  ;;  %v2123_v23 = vsel %vm1885_vm14, %v2122_v7, %v2118_v45 }
 0x2a1   :  { %v2206_v0 = vsel %vm2205_vm0, %v2044_v60, %v4068_v44 }
 0x2a2   :  { %v2201_v4 = vrot.slane %v1695_v62, %v3982_v42  ;;  %v2208_v46 = vsel %vm2207_vm1, %v2123_v23, %v2206_v0 }
 0x2a4   :  { %v2202_v22 = vsel %vm1885_vm14, %v2201_v4, %v2197_v3 }
 0x2a5   :  { %v2210_v38 = vsel %vm2209_vm2, %v2202_v22, %v2208_v46 }
 0x2a6   :  { %2212 = vst [vmem:[%s4199_s5] sm:$0x1f] %v2210_v38 }
 0x2a7   :  { %2217 = vsyncpa [#allocation4], 1 }
 0x2a8   :  { %2218 = vsyncpa [#allocation6], 1 }

</bundles_post_ra>
